<compile_context>
chip_gen: v7x
topology: tpu7x:2x2x1
jax: 0.10.0
libtpu: 0.0.40
codegen_flags: <defaults>
</compile_context>

<pallas_src>
import jax
import jax.numpy as jnp
from jax import lax
from jax.experimental import pallas as pl
from jax.experimental.pallas import tpu as pltpu

# Small synthetic sizes consistent with the module (rank stays 128 as in source).
RANK = 128
ULEN = 16          # number of users
VLEN = 32          # number of items
BATCH = 8          # number of (user, item) training pairs in R
LABDA2 = 1.0
LABDA4 = 0.001

_PREC = lax.Precision.HIGHEST   # exact f32 MXU passes in kernel AND reference


# ----------------------------- in-kernel math ------------------------------ #
def _mm(a, b):
    return jnp.dot(a, b, preferred_element_type=jnp.float32, precision=_PREC)


def _mm_nt(a, b):
    # a @ b.T on the MXU, contracting the lane (rank) axis of both operands.
    return lax.dot_general(a, b, (((1,), (1,)), ((), ())),
                           preferred_element_type=jnp.float32, precision=_PREC)


def _sigmoid(x):
    # numerically stable sigmoid: 0.5*(tanh(x/2)+1)  (EUP tanh, no exp overflow)
    return 0.5 * jnp.tanh(0.5 * x) + 0.5


def _log_sigmoid(x):
    # stable logsigmoid = min(x, 0) - log(1 + exp(-|x|))
    return jnp.minimum(x, 0.0) - jnp.log(1.0 + jnp.exp(-jnp.abs(x)))


def _log_softmax(x):
    m = jnp.max(x, axis=-1, keepdims=True)
    s = x - m
    return s - jnp.log(jnp.sum(jnp.exp(s), axis=-1, keepdims=True))


def _softmax_pair(x):
    # (softmax(x), log_softmax(x)); log taken from logits, never log(softmax).
    m = jnp.max(x, axis=-1, keepdims=True)
    s = x - m
    e = jnp.exp(s)
    denom = jnp.sum(e, axis=-1, keepdims=True)
    return e / denom, s - jnp.log(denom)


def _kl_sum(p, logp, logq):
    # F.kl_div(input=logq, target=p, reduction='sum') = sum p * (log p - log q)
    return jnp.sum(p * (logp - logq), keepdims=True)          # (1, 1)


# -------------------------------- kernel ----------------------------------- #
def bine_loss_kernel(eu_ref, ev_ref, w_ref, su_ref, sv_ref, iu_ref, iv_ref,
                     out_ref):
    eu = eu_ref[...]          # (ULEN, RANK)
    ev = ev_ref[...]          # (VLEN, RANK)
    w = w_ref[...]            # (ULEN, VLEN)

    # (A) Gram blocks at their true sizes (exact f32 MXU, no padded slabs).
    u = _mm_nt(eu, eu)        # (16, 16)  = Eu @ Eu.T
    v = _mm_nt(ev, ev)        # (32, 32)  = Ev @ Ev.T
    r = _mm_nt(eu, ev)        # (16, 32)  = Eu @ Ev.T

    # (B) positive pairs: dots[b] = r[iu[b], iv[b]] via one-hot rows
    #     (single compare per one-hot; no serial SMEM-select chain).
    oh_u = (lax.broadcasted_iota(jnp.int32, (BATCH, ULEN), 1)
            == iu_ref[...]).astype(jnp.float32)               # (8, 16)
    oh_v = (lax.broadcasted_iota(jnp.int32, (BATCH, VLEN), 1)
            == iv_ref[...]).astype(jnp.float32)               # (8, 32)
    r_rows = _mm(oh_u, r)                                     # (8, 32) = r[iu[b], :]
    dots = jnp.sum(r_rows * oh_v, axis=-1, keepdims=True)     # (8, 1)
    loss_pos = -jnp.sum(_log_sigmoid(dots), keepdims=True) / float(BATCH)

    # (C) lambda2 KL terms: KL( softmax(su/sv) || softmax(sigmoid(u/v)) )
    p_su, logp_su = _softmax_pair(su_ref[...])                # (16, 16)
    kl_u = _kl_sum(p_su, logp_su, _log_softmax(_sigmoid(u)))
    p_sv, logp_sv = _softmax_pair(sv_ref[...])                # (32, 32)
    kl_v = _kl_sum(p_sv, logp_sv, _log_softmax(_sigmoid(v)))

    # (D) softmax(R) target (feeds both lambda4 terms).
    p_r, logp_r = _softmax_pair(r)                            # (16, 32)

    # (E) uloss3: KL( p_r || softmax((u / rowsum(u)) @ W) )
    norm_u = u / jnp.sum(u, axis=-1, keepdims=True)           # (16, 16)
    uloss3 = _kl_sum(p_r, logp_r, _log_softmax(_mm(norm_u, w)))

    # (F) vloss3: KL( p_r || softmax(W @ (v / rowsum(v))) ) — normalize v only.
    norm_v = v / jnp.sum(v, axis=-1, keepdims=True)           # (32, 32)
    vloss3 = _kl_sum(p_r, logp_r, _log_softmax(_mm(w, norm_v)))

    out_ref[...] = (loss_pos
                    + LABDA2 * (kl_u + kl_v)
                    + LABDA4 * (uloss3 + vloss3))


# ------------------------------- wrapper ------------------------------------ #
@jax.jit
def bine_forward(r_pairs, vectors_u, vectors_v, w, su, sv):
    # R is stored as float and cast with .long() in the torch forward; mirror
    # with an int32 cast. (8,1) columns let the kernel build one-hots with a
    # single broadcast compare.
    iu = r_pairs[0].astype(jnp.int32).reshape(BATCH, 1)
    iv = r_pairs[1].astype(jnp.int32).reshape(BATCH, 1)

    vmem = pl.BlockSpec(memory_space=pltpu.MemorySpace.VMEM)
    out = pl.pallas_call(
        bine_loss_kernel,
        out_shape=jax.ShapeDtypeStruct((1, 1), jnp.float32),
        in_specs=[vmem] * 7,
        out_specs=vmem,
    )(vectors_u, vectors_v, w, su, sv, iu, iv)
    return out[0, 0]


# --------------------------- pure-JAX reference ----------------------------- #
def bine_reference(r_pairs, vectors_u, vectors_v, w, su, sv):
    r0 = r_pairs[0].astype(jnp.int32)
    r1 = r_pairs[1].astype(jnp.int32)
    outputs = jnp.sum(vectors_u[r0] * vectors_v[r1], axis=1)
    positivebatch = jax.nn.log_sigmoid(outputs)

    u = jnp.dot(vectors_u, vectors_u.T, precision=_PREC)
    v = jnp.dot(vectors_v, vectors_v.T, precision=_PREC)

    def kl(logq, p):
        return jnp.sum(p * (jnp.log(p) - logq))

    kl_u = kl(jax.nn.log_softmax(jax.nn.sigmoid(u), -1), jax.nn.softmax(su, -1))
    kl_v = kl(jax.nn.log_softmax(jax.nn.sigmoid(v), -1), jax.nn.softmax(sv, -1))

    r = jnp.dot(vectors_u, vectors_v.T, precision=_PREC)
    p_r = jax.nn.softmax(r, -1)
    norm_u = u / jnp.sum(u, axis=1, keepdims=True)
    uloss3 = kl(jax.nn.log_softmax(jnp.dot(norm_u, w, precision=_PREC), -1), p_r)
    norm_v = v / jnp.sum(v, axis=1, keepdims=True)
    vloss3 = kl(jax.nn.log_softmax(jnp.dot(w, norm_v, precision=_PREC), -1), p_r)

    return (-jnp.mean(positivebatch)
            + LABDA2 * kl_u + LABDA2 * kl_v
            + LABDA4 * uloss3 + LABDA4 * vloss3)


# --------------------------------- main -------------------------------------- #
if __name__ == "__main__":
    key = jax.random.PRNGKey(0)
    k_u, k_v, k_w, k_r0, k_r1 = jax.random.split(key, 5)

    # Deterministic synthetic parameters (module __init__ shapes):
    vectors_u = 0.1 * jax.random.normal(k_u, (ULEN, RANK), dtype=jnp.float32)
    vectors_v = 0.1 * jax.random.normal(k_v, (VLEN, RANK), dtype=jnp.float32)
    # Module-level W is zeros in the source (would make su/sv NaN); use a
    # positive deterministic matrix instead so the row-normalizations are valid.
    W = jax.random.uniform(k_w, (ULEN, VLEN), dtype=jnp.float32,
                           minval=0.1, maxval=1.0)

    # Module-level constants su / sv (row-normalized co-occurrence matrices).
    u_mat = jnp.dot(W, W.T, precision=_PREC)
    su = u_mat / jnp.sum(u_mat, axis=1, keepdims=True)
    v_mat = jnp.dot(W.T, W, precision=_PREC)
    sv = v_mat / jnp.sum(v_mat, axis=1, keepdims=True)

    # Training batch R: row 0 = user ids, row 1 = item ids (stored as float,
    # cast to integer indices in the forward, mirroring the torch .long()).
    r0 = jax.random.randint(k_r0, (BATCH,), 0, ULEN).astype(jnp.float32)
    r1 = jax.random.randint(k_r1, (BATCH,), 0, VLEN).astype(jnp.float32)
    r_pairs = jnp.stack([r0, r1], axis=0)                    # (2, BATCH)

    loss = bine_forward(r_pairs, vectors_u, vectors_v, W, su, sv)
    jax.block_until_ready(loss)

    ref = bine_reference(r_pairs, vectors_u, vectors_v, W, su, sv)
    jax.block_until_ready(ref)

    assert jnp.isfinite(loss), "kernel produced non-finite loss"
    assert jnp.allclose(loss, ref, rtol=1e-4, atol=1e-4), (loss, ref)
    print("KERNEL_OK")
</pallas_src>

<mosaic_0001>
module attributes {stable_mosaic.version = 11 : i64} {
  func.func @bine_loss_kernel(%arg0: memref<16x128xf32, #tpu.memory_space<vmem>>, %arg1: memref<32x128xf32, #tpu.memory_space<vmem>>, %arg2: memref<16x32xf32, #tpu.memory_space<vmem>>, %arg3: memref<16x16xf32, #tpu.memory_space<vmem>>, %arg4: memref<32x32xf32, #tpu.memory_space<vmem>>, %arg5: memref<8x1xi32, #tpu.memory_space<vmem>>, %arg6: memref<8x1xi32, #tpu.memory_space<vmem>>, %arg7: memref<1x1xf32, #tpu.memory_space<vmem>>) attributes {dimension_semantics = [], scalar_prefetch = 0 : i64, scratch_operands = 0 : i64, tpu.core_type = #tpu.core_type<tc>} {
    %c0 = arith.constant 0 : index
    %c0_0 = arith.constant 0 : index
    %0 = vector.load %arg0[%c0, %c0_0] : memref<16x128xf32, #tpu.memory_space<vmem>>, vector<16x128xf32>
    %c0_1 = arith.constant 0 : index
    %c0_2 = arith.constant 0 : index
    %1 = vector.load %arg1[%c0_1, %c0_2] : memref<32x128xf32, #tpu.memory_space<vmem>>, vector<32x128xf32>
    %c0_3 = arith.constant 0 : index
    %c0_4 = arith.constant 0 : index
    %2 = vector.load %arg2[%c0_3, %c0_4] : memref<16x32xf32, #tpu.memory_space<vmem>>, vector<16x32xf32>
    %cst = arith.constant dense<0.000000e+00> : vector<16x16xf32>
    %3 = tpu.matmul %0, %0, %cst {dimension_numbers = #tpu.dot_dimension_numbers<[1], [1], [0], [0], [0, 0, 1, 0], [], []>, precision = #tpu.contract_precision<fp32>} : vector<16x128xf32>, vector<16x128xf32>, vector<16x16xf32> -> vector<16x16xf32>
    %cst_5 = arith.constant dense<0.000000e+00> : vector<32x32xf32>
    %4 = tpu.matmul %1, %1, %cst_5 {dimension_numbers = #tpu.dot_dimension_numbers<[1], [1], [0], [0], [0, 0, 1, 0], [], []>, precision = #tpu.contract_precision<fp32>} : vector<32x128xf32>, vector<32x128xf32>, vector<32x32xf32> -> vector<32x32xf32>
    %cst_6 = arith.constant dense<0.000000e+00> : vector<16x32xf32>
    %5 = tpu.matmul %0, %1, %cst_6 {dimension_numbers = #tpu.dot_dimension_numbers<[1], [1], [0], [0], [0, 0, 1, 0], [], []>, precision = #tpu.contract_precision<fp32>} : vector<16x128xf32>, vector<32x128xf32>, vector<16x32xf32> -> vector<16x32xf32>
    %6 = tpu.iota {dimensions = array<i32: 1>} : vector<8x16xi32>
    %c0_7 = arith.constant 0 : index
    %c0_8 = arith.constant 0 : index
    %7 = vector.load %arg5[%c0_7, %c0_8] : memref<8x1xi32, #tpu.memory_space<vmem>>, vector<8x1xi32>
    %8 = vector.broadcast %7 : vector<8x1xi32> to vector<8x16xi32>
    %9 = arith.cmpi eq, %6, %8 : vector<8x16xi32>
    %10 = arith.extui %9 : vector<8x16xi1> to vector<8x16xi32>
    %11 = arith.sitofp %10 : vector<8x16xi32> to vector<8x16xf32>
    %12 = tpu.iota {dimensions = array<i32: 1>} : vector<8x32xi32>
    %c0_9 = arith.constant 0 : index
    %c0_10 = arith.constant 0 : index
    %13 = vector.load %arg6[%c0_9, %c0_10] : memref<8x1xi32, #tpu.memory_space<vmem>>, vector<8x1xi32>
    %14 = vector.broadcast %13 : vector<8x1xi32> to vector<8x32xi32>
    %15 = arith.cmpi eq, %12, %14 : vector<8x32xi32>
    %16 = arith.extui %15 : vector<8x32xi1> to vector<8x32xi32>
    %17 = arith.sitofp %16 : vector<8x32xi32> to vector<8x32xf32>
    %cst_11 = arith.constant dense<0.000000e+00> : vector<8x32xf32>
    %18 = tpu.matmul %11, %5, %cst_11 {dimension_numbers = #tpu.dot_dimension_numbers<[1], [0], [0], [1], [0, 0, 1, 1], [], []>, precision = #tpu.contract_precision<fp32>} : vector<8x16xf32>, vector<16x32xf32>, vector<8x32xf32> -> vector<8x32xf32>
    %19 = arith.mulf %18, %17 : vector<8x32xf32>
    %cst_12 = arith.constant dense<0.000000e+00> : vector<8xf32>
    %20 = vector.multi_reduction <add>, %19, %cst_12 [1] : vector<8x32xf32> to vector<8xf32>
    %21 = vector.shape_cast %20 : vector<8xf32> to vector<8x1xf32>
    %cst_13 = arith.constant 0.000000e+00 : f32
    %22 = vector.broadcast %cst_13 : f32 to vector<8x1xf32>
    %23 = arith.minimumf %21, %22 : vector<8x1xf32>
    %24 = math.absf %21 : vector<8x1xf32>
    %cst_14 = arith.constant 0.000000e+00 : f32
    %25 = vector.broadcast %cst_14 : f32 to vector<8x1xf32>
    %26 = arith.subf %25, %24 : vector<8x1xf32>
    %27 = math.exp %26 : vector<8x1xf32>
    %cst_15 = arith.constant 1.000000e+00 : f32
    %28 = vector.broadcast %cst_15 : f32 to vector<8x1xf32>
    %29 = arith.addf %28, %27 : vector<8x1xf32>
    %30 = math.log %29 : vector<8x1xf32>
    %31 = arith.subf %23, %30 : vector<8x1xf32>
    %32 = vector.shape_cast %31 : vector<8x1xf32> to vector<1x8x1xf32>
    %cst_16 = arith.constant dense<0.000000e+00> : vector<1xf32>
    %33 = vector.multi_reduction <add>, %32, %cst_16 [1, 2] : vector<1x8x1xf32> to vector<1xf32>
    %34 = vector.shape_cast %33 : vector<1xf32> to vector<1x1x1xf32>
    %35 = vector.extract %34[0, 0, 0] : f32 from vector<1x1x1xf32>
    %36 = vector.broadcast %35 : f32 to vector<1x1xf32>
    %cst_17 = arith.constant 0.000000e+00 : f32
    %37 = vector.broadcast %cst_17 : f32 to vector<1x1xf32>
    %38 = arith.subf %37, %36 : vector<1x1xf32>
    %cst_18 = arith.constant 8.000000e+00 : f32
    %39 = vector.broadcast %cst_18 : f32 to vector<1x1xf32>
    %40 = arith.divf %38, %39 : vector<1x1xf32>
    %c0_19 = arith.constant 0 : index
    %c0_20 = arith.constant 0 : index
    %41 = vector.load %arg3[%c0_19, %c0_20] : memref<16x16xf32, #tpu.memory_space<vmem>>, vector<16x16xf32>
    %cst_21 = arith.constant dense<0xFF800000> : vector<16xf32>
    %42 = vector.multi_reduction <maximumf>, %41, %cst_21 [1] : vector<16x16xf32> to vector<16xf32>
    %43 = vector.shape_cast %42 : vector<16xf32> to vector<16x1xf32>
    %44 = vector.broadcast %43 : vector<16x1xf32> to vector<16x16xf32>
    %45 = arith.subf %41, %44 : vector<16x16xf32>
    %46 = math.exp %45 : vector<16x16xf32>
    %cst_22 = arith.constant dense<0.000000e+00> : vector<16xf32>
    %47 = vector.multi_reduction <add>, %46, %cst_22 [1] : vector<16x16xf32> to vector<16xf32>
    %48 = vector.shape_cast %47 : vector<16xf32> to vector<16x1xf32>
    %49 = vector.broadcast %48 : vector<16x1xf32> to vector<16x16xf32>
    %50 = arith.divf %46, %49 : vector<16x16xf32>
    %51 = math.log %48 : vector<16x1xf32>
    %52 = vector.broadcast %51 : vector<16x1xf32> to vector<16x16xf32>
    %53 = arith.subf %45, %52 : vector<16x16xf32>
    %cst_23 = arith.constant 5.000000e-01 : f32
    %54 = vector.broadcast %cst_23 : f32 to vector<16x16xf32>
    %55 = arith.mulf %54, %3 : vector<16x16xf32>
    %56 = math.tanh %55 : vector<16x16xf32>
    %cst_24 = arith.constant 5.000000e-01 : f32
    %57 = vector.broadcast %cst_24 : f32 to vector<16x16xf32>
    %58 = arith.mulf %57, %56 : vector<16x16xf32>
    %cst_25 = arith.constant 5.000000e-01 : f32
    %59 = vector.broadcast %cst_25 : f32 to vector<16x16xf32>
    %60 = arith.addf %58, %59 : vector<16x16xf32>
    %cst_26 = arith.constant dense<0xFF800000> : vector<16xf32>
    %61 = vector.multi_reduction <maximumf>, %60, %cst_26 [1] : vector<16x16xf32> to vector<16xf32>
    %62 = vector.shape_cast %61 : vector<16xf32> to vector<16x1xf32>
    %63 = vector.broadcast %62 : vector<16x1xf32> to vector<16x16xf32>
    %64 = arith.subf %60, %63 : vector<16x16xf32>
    %65 = math.exp %64 : vector<16x16xf32>
    %cst_27 = arith.constant dense<0.000000e+00> : vector<16xf32>
    %66 = vector.multi_reduction <add>, %65, %cst_27 [1] : vector<16x16xf32> to vector<16xf32>
    %67 = vector.shape_cast %66 : vector<16xf32> to vector<16x1xf32>
    %68 = math.log %67 : vector<16x1xf32>
    %69 = vector.broadcast %68 : vector<16x1xf32> to vector<16x16xf32>
    %70 = arith.subf %64, %69 : vector<16x16xf32>
    %71 = arith.subf %53, %70 : vector<16x16xf32>
    %72 = arith.mulf %50, %71 : vector<16x16xf32>
    %73 = vector.shape_cast %72 : vector<16x16xf32> to vector<1x16x16xf32>
    %cst_28 = arith.constant dense<0.000000e+00> : vector<1xf32>
    %74 = vector.multi_reduction <add>, %73, %cst_28 [1, 2] : vector<1x16x16xf32> to vector<1xf32>
    %75 = vector.shape_cast %74 : vector<1xf32> to vector<1x1x1xf32>
    %76 = vector.extract %75[0, 0, 0] : f32 from vector<1x1x1xf32>
    %77 = vector.broadcast %76 : f32 to vector<1x1xf32>
    %c0_29 = arith.constant 0 : index
    %c0_30 = arith.constant 0 : index
    %78 = vector.load %arg4[%c0_29, %c0_30] : memref<32x32xf32, #tpu.memory_space<vmem>>, vector<32x32xf32>
    %cst_31 = arith.constant dense<0xFF800000> : vector<32xf32>
    %79 = vector.multi_reduction <maximumf>, %78, %cst_31 [1] : vector<32x32xf32> to vector<32xf32>
    %80 = vector.shape_cast %79 : vector<32xf32> to vector<32x1xf32>
    %81 = vector.broadcast %80 : vector<32x1xf32> to vector<32x32xf32>
    %82 = arith.subf %78, %81 : vector<32x32xf32>
    %83 = math.exp %82 : vector<32x32xf32>
    %cst_32 = arith.constant dense<0.000000e+00> : vector<32xf32>
    %84 = vector.multi_reduction <add>, %83, %cst_32 [1] : vector<32x32xf32> to vector<32xf32>
    %85 = vector.shape_cast %84 : vector<32xf32> to vector<32x1xf32>
    %86 = vector.broadcast %85 : vector<32x1xf32> to vector<32x32xf32>
    %87 = arith.divf %83, %86 : vector<32x32xf32>
    %88 = math.log %85 : vector<32x1xf32>
    %89 = vector.broadcast %88 : vector<32x1xf32> to vector<32x32xf32>
    %90 = arith.subf %82, %89 : vector<32x32xf32>
    %cst_33 = arith.constant 5.000000e-01 : f32
    %91 = vector.broadcast %cst_33 : f32 to vector<32x32xf32>
    %92 = arith.mulf %91, %4 : vector<32x32xf32>
    %93 = math.tanh %92 : vector<32x32xf32>
    %cst_34 = arith.constant 5.000000e-01 : f32
    %94 = vector.broadcast %cst_34 : f32 to vector<32x32xf32>
    %95 = arith.mulf %94, %93 : vector<32x32xf32>
    %cst_35 = arith.constant 5.000000e-01 : f32
    %96 = vector.broadcast %cst_35 : f32 to vector<32x32xf32>
    %97 = arith.addf %95, %96 : vector<32x32xf32>
    %cst_36 = arith.constant dense<0xFF800000> : vector<32xf32>
    %98 = vector.multi_reduction <maximumf>, %97, %cst_36 [1] : vector<32x32xf32> to vector<32xf32>
    %99 = vector.shape_cast %98 : vector<32xf32> to vector<32x1xf32>
    %100 = vector.broadcast %99 : vector<32x1xf32> to vector<32x32xf32>
    %101 = arith.subf %97, %100 : vector<32x32xf32>
    %102 = math.exp %101 : vector<32x32xf32>
    %cst_37 = arith.constant dense<0.000000e+00> : vector<32xf32>
    %103 = vector.multi_reduction <add>, %102, %cst_37 [1] : vector<32x32xf32> to vector<32xf32>
    %104 = vector.shape_cast %103 : vector<32xf32> to vector<32x1xf32>
    %105 = math.log %104 : vector<32x1xf32>
    %106 = vector.broadcast %105 : vector<32x1xf32> to vector<32x32xf32>
    %107 = arith.subf %101, %106 : vector<32x32xf32>
    %108 = arith.subf %90, %107 : vector<32x32xf32>
    %109 = arith.mulf %87, %108 : vector<32x32xf32>
    %110 = vector.shape_cast %109 : vector<32x32xf32> to vector<1x32x32xf32>
    %cst_38 = arith.constant dense<0.000000e+00> : vector<1xf32>
    %111 = vector.multi_reduction <add>, %110, %cst_38 [1, 2] : vector<1x32x32xf32> to vector<1xf32>
    %112 = vector.shape_cast %111 : vector<1xf32> to vector<1x1x1xf32>
    %113 = vector.extract %112[0, 0, 0] : f32 from vector<1x1x1xf32>
    %114 = vector.broadcast %113 : f32 to vector<1x1xf32>
    %cst_39 = arith.constant dense<0xFF800000> : vector<16xf32>
    %115 = vector.multi_reduction <maximumf>, %5, %cst_39 [1] : vector<16x32xf32> to vector<16xf32>
    %116 = vector.shape_cast %115 : vector<16xf32> to vector<16x1xf32>
    %117 = vector.broadcast %116 : vector<16x1xf32> to vector<16x32xf32>
    %118 = arith.subf %5, %117 : vector<16x32xf32>
    %119 = math.exp %118 : vector<16x32xf32>
    %cst_40 = arith.constant dense<0.000000e+00> : vector<16xf32>
    %120 = vector.multi_reduction <add>, %119, %cst_40 [1] : vector<16x32xf32> to vector<16xf32>
    %121 = vector.shape_cast %120 : vector<16xf32> to vector<16x1xf32>
    %122 = vector.broadcast %121 : vector<16x1xf32> to vector<16x32xf32>
    %123 = arith.divf %119, %122 : vector<16x32xf32>
    %124 = math.log %121 : vector<16x1xf32>
    %125 = vector.broadcast %124 : vector<16x1xf32> to vector<16x32xf32>
    %126 = arith.subf %118, %125 : vector<16x32xf32>
    %cst_41 = arith.constant dense<0.000000e+00> : vector<16xf32>
    %127 = vector.multi_reduction <add>, %3, %cst_41 [1] : vector<16x16xf32> to vector<16xf32>
    %128 = vector.shape_cast %127 : vector<16xf32> to vector<16x1xf32>
    %129 = vector.broadcast %128 : vector<16x1xf32> to vector<16x16xf32>
    %130 = arith.divf %3, %129 : vector<16x16xf32>
    %cst_42 = arith.constant dense<0.000000e+00> : vector<16x32xf32>
    %131 = tpu.matmul %130, %2, %cst_42 {dimension_numbers = #tpu.dot_dimension_numbers<[1], [0], [0], [1], [0, 0, 1, 1], [], []>, precision = #tpu.contract_precision<fp32>} : vector<16x16xf32>, vector<16x32xf32>, vector<16x32xf32> -> vector<16x32xf32>
    %cst_43 = arith.constant dense<0xFF800000> : vector<16xf32>
    %132 = vector.multi_reduction <maximumf>, %131, %cst_43 [1] : vector<16x32xf32> to vector<16xf32>
    %133 = vector.shape_cast %132 : vector<16xf32> to vector<16x1xf32>
    %134 = vector.broadcast %133 : vector<16x1xf32> to vector<16x32xf32>
    %135 = arith.subf %131, %134 : vector<16x32xf32>
    %136 = math.exp %135 : vector<16x32xf32>
    %cst_44 = arith.constant dense<0.000000e+00> : vector<16xf32>
    %137 = vector.multi_reduction <add>, %136, %cst_44 [1] : vector<16x32xf32> to vector<16xf32>
    %138 = vector.shape_cast %137 : vector<16xf32> to vector<16x1xf32>
    %139 = math.log %138 : vector<16x1xf32>
    %140 = vector.broadcast %139 : vector<16x1xf32> to vector<16x32xf32>
    %141 = arith.subf %135, %140 : vector<16x32xf32>
    %142 = arith.subf %126, %141 : vector<16x32xf32>
    %143 = arith.mulf %123, %142 : vector<16x32xf32>
    %144 = vector.shape_cast %143 : vector<16x32xf32> to vector<1x16x32xf32>
    %cst_45 = arith.constant dense<0.000000e+00> : vector<1xf32>
    %145 = vector.multi_reduction <add>, %144, %cst_45 [1, 2] : vector<1x16x32xf32> to vector<1xf32>
    %146 = vector.shape_cast %145 : vector<1xf32> to vector<1x1x1xf32>
    %147 = vector.extract %146[0, 0, 0] : f32 from vector<1x1x1xf32>
    %148 = vector.broadcast %147 : f32 to vector<1x1xf32>
    %cst_46 = arith.constant dense<0.000000e+00> : vector<32xf32>
    %149 = vector.multi_reduction <add>, %4, %cst_46 [1] : vector<32x32xf32> to vector<32xf32>
    %150 = vector.shape_cast %149 : vector<32xf32> to vector<32x1xf32>
    %151 = vector.broadcast %150 : vector<32x1xf32> to vector<32x32xf32>
    %152 = arith.divf %4, %151 : vector<32x32xf32>
    %cst_47 = arith.constant dense<0.000000e+00> : vector<16x32xf32>
    %153 = tpu.matmul %2, %152, %cst_47 {dimension_numbers = #tpu.dot_dimension_numbers<[1], [0], [0], [1], [0, 0, 1, 1], [], []>, precision = #tpu.contract_precision<fp32>} : vector<16x32xf32>, vector<32x32xf32>, vector<16x32xf32> -> vector<16x32xf32>
    %cst_48 = arith.constant dense<0xFF800000> : vector<16xf32>
    %154 = vector.multi_reduction <maximumf>, %153, %cst_48 [1] : vector<16x32xf32> to vector<16xf32>
    %155 = vector.shape_cast %154 : vector<16xf32> to vector<16x1xf32>
    %156 = vector.broadcast %155 : vector<16x1xf32> to vector<16x32xf32>
    %157 = arith.subf %153, %156 : vector<16x32xf32>
    %158 = math.exp %157 : vector<16x32xf32>
    %cst_49 = arith.constant dense<0.000000e+00> : vector<16xf32>
    %159 = vector.multi_reduction <add>, %158, %cst_49 [1] : vector<16x32xf32> to vector<16xf32>
    %160 = vector.shape_cast %159 : vector<16xf32> to vector<16x1xf32>
    %161 = math.log %160 : vector<16x1xf32>
    %162 = vector.broadcast %161 : vector<16x1xf32> to vector<16x32xf32>
    %163 = arith.subf %157, %162 : vector<16x32xf32>
    %164 = arith.subf %126, %163 : vector<16x32xf32>
    %165 = arith.mulf %123, %164 : vector<16x32xf32>
    %166 = vector.shape_cast %165 : vector<16x32xf32> to vector<1x16x32xf32>
    %cst_50 = arith.constant dense<0.000000e+00> : vector<1xf32>
    %167 = vector.multi_reduction <add>, %166, %cst_50 [1, 2] : vector<1x16x32xf32> to vector<1xf32>
    %168 = vector.shape_cast %167 : vector<1xf32> to vector<1x1x1xf32>
    %169 = vector.extract %168[0, 0, 0] : f32 from vector<1x1x1xf32>
    %170 = vector.broadcast %169 : f32 to vector<1x1xf32>
    %171 = arith.addf %77, %114 : vector<1x1xf32>
    %cst_51 = arith.constant 1.000000e+00 : f32
    %172 = vector.broadcast %cst_51 : f32 to vector<1x1xf32>
    %173 = arith.mulf %172, %171 : vector<1x1xf32>
    %174 = arith.addf %40, %173 : vector<1x1xf32>
    %175 = arith.addf %148, %170 : vector<1x1xf32>
    %cst_52 = arith.constant 1.000000e-03 : f32
    %176 = vector.broadcast %cst_52 : f32 to vector<1x1xf32>
    %177 = arith.mulf %176, %175 : vector<1x1xf32>
    %178 = arith.addf %174, %177 : vector<1x1xf32>
    %c0_53 = arith.constant 0 : index
    %c0_54 = arith.constant 0 : index
    %179 = vector.load %arg7[%c0_53, %c0_54] : memref<1x1xf32, #tpu.memory_space<vmem>>, vector<1x1xf32>
    tpu.vector_store %arg7[%c0_53, %c0_54], %178 {strides = array<i32>} : memref<1x1xf32, #tpu.memory_space<vmem>>, vector<1x1xf32>,
    return
  }
}

</mosaic_0001>

<bundles_post_ra>
// kernel: bine_forward.1
= control target key start
LH: loop header
LB: loop body
LE: loop exit
PB: predicated region body
PF: predicated region fallthrough
CT: control target
= control target key end

     0   :  { %12 = vsyncpa [#allocation3], 0  ;;  %s5422_s0 = inlined_call_operand.hbm [shape: f32[16,128], index: 0, kind: input, shape index: {}]   ;;  %s5423_s1 = inlined_call_operand.vmem [shape: f32[32,128], index: 1, kind: input, shape index: {}]   ;;  %s5424_s2 = inlined_call_operand.hbm [shape: f32[16,32], index: 2, kind: input, shape index: {}]   ;;  %s5425_s3 = inlined_call_operand.hbm [shape: f32[16,16], index: 3, kind: input, shape index: {}]   ;;  %s5426_s4 = inlined_call_operand.hbm [shape: f32[32,32], index: 4, kind: input, shape index: {}]   ;;  %s5427_s5 = inlined_call_operand.vmem [shape: s32[8,1], index: 5, kind: input, shape index: {}]   ;;  %s5428_s6 = inlined_call_operand.vmem [shape: s32[8,1], index: 6, kind: input, shape index: {}]   ;;  %s5429_s7 = inlined_call_operand.hbm [shape: f32[1,1], index: 7, kind: output, shape index: {}]  }
   0x1   :  { %13 = vsyncpa [#allocation6], 0 }
   0x2   :  { %14 = vsyncpa [#allocation9], 0 }
   0x3   :  { %15 = vsyncpa [#allocation4], 0  ;;  %s4745_s24 = smov [#allocation5]   ;;  %s4746_s26 = smov [#allocation2]  }
   0x4   :  { %s35_s25 = sshll.u32 %s4745_s24, 4  ;;  %s21_s27 = sshll.u32 %s4746_s26, 4  ;;  %s36_s25 = int_to_ptr.vmem [resolvable:$true] %s35_s25  ;;  %s4796_s27 = int_to_ptr.vmem [resolvable:$true] %s21_s27 }
   0x5   :  { %s4627_s30 = scalar_lea.hbm %s5424_s2, 256 }
   0x6   :  { %p4628_p0 = scmp.ne.s32.totalorder %s5424_s2, %s4627_s30  ;;  %p4631_p1 = scmp.lt.u32.totalorder %s4627_s30, %s5424_s2 }
   0x8   :  { %p4633_p2 = pnand %p4631_p1, %p4628_p0 }
   0xa   :  { %4636 = shalt.err (!%p4633_p2)
}
   0xb   :  { %s4637_s12 = scalar_lea.vmem %s36_s25, 256  ;;  %p4642_p4 = scmp.lt.s32.totalorder %s36_s25, %s36_s25 }
   0xc   :  { %p4638_p3 = scmp.ne.s32.totalorder %s36_s25, %s4637_s12  ;;  %p4643_p5 = scmp.lt.s32.totalorder %s4637_s12, %s4637_s12 }
   0xe   :  { %p4644_p6 = por %p4643_p5, %p4642_p4 }
  0x10   :  { %p4645_p7 = pnand %p4644_p6, %p4638_p3 }
  0x12   :  { %4648 = shalt.err (!%p4645_p7)
}
  0x13   :  { %s4747_s13 = smov 128   ;;  %s4748_s14 = smov 8  }
  0x14   :  { %41 = dma.hbm_to_vmem [thread:$0]  %s5424_s2, 256, %s36_s25, [#allocation6], %s4747_s13, %s4747_s13, %s4748_s14  }
  0x15   :  { %s4649_s19 = scalar_lea.hbm %s5422_s0, 256 }
  0x16   :  { %p4650_p8 = scmp.ne.s32.totalorder %s5422_s0, %s4649_s19  ;;  %p4653_p9 = scmp.lt.u32.totalorder %s4649_s19, %s5422_s0 }
  0x18   :  { %p4655_p10 = pnand %p4653_p9, %p4650_p8 }
  0x1a   :  { %4658 = shalt.err (!%p4655_p10)
}
  0x1b   :  { %s4659_s24 = scalar_lea.vmem %s4796_s27, 256  ;;  %p4664_p12 = scmp.lt.s32.totalorder %s4796_s27, %s4796_s27 }
  0x1c   :  { %p4660_p11 = scmp.ne.s32.totalorder %s4796_s27, %s4659_s24  ;;  %p4665_p13 = scmp.lt.s32.totalorder %s4659_s24, %s4659_s24 }
  0x1e   :  { %p4666_p0 = por %p4665_p13, %p4664_p12 }
  0x20   :  { %p4667_p1 = pnand %p4666_p0, %p4660_p11 }
  0x22   :  { %4670 = shalt.err (!%p4667_p1)
}
  0x23   :  { %27 = dma.hbm_to_vmem [thread:$0]  %s5422_s0, 256, %s4796_s27, [#allocation3], %s4747_s13, %s4747_s13, %s4748_s14  }
  0x24   :  { %s4749_s26 = smov [#allocation7]   ;;  %s4750_s29 = smov [#allocation8]  }
  0x25   :  { %s47_s28 = sshll.u32 %s4749_s26, 4  ;;  %s59_s30 = sshll.u32 %s4750_s29, 4  ;;  %s48_s28 = int_to_ptr.vmem [resolvable:$true] %s47_s28  ;;  %s4833_s30 = int_to_ptr.vmem [resolvable:$true] %s59_s30 }
  0x26   :  { %s4671_s10 = scalar_lea.hbm %s5425_s3, 256 }
  0x27   :  { %p4672_p2 = scmp.ne.s32.totalorder %s5425_s3, %s4671_s10  ;;  %p4675_p3 = scmp.lt.u32.totalorder %s4671_s10, %s5425_s3 }
  0x29   :  { %p4677_p4 = pnand %p4675_p3, %p4672_p2 }
  0x2b   :  { %4680 = shalt.err (!%p4677_p4)
}
  0x2c   :  { %s4681_s0 = scalar_lea.vmem %s48_s28, 256  ;;  %p4686_p6 = scmp.lt.s32.totalorder %s48_s28, %s48_s28 }
  0x2d   :  { %p4682_p5 = scmp.ne.s32.totalorder %s48_s28, %s4681_s0  ;;  %p4687_p7 = scmp.lt.s32.totalorder %s4681_s0, %s4681_s0 }
  0x2f   :  { %p4688_p8 = por %p4687_p7, %p4686_p6 }
  0x31   :  { %p4689_p9 = pnand %p4688_p8, %p4682_p5 }
  0x33   :  { %4692 = shalt.err (!%p4689_p9)
}
  0x34   :  { %53 = dma.hbm_to_vmem [thread:$0]  %s5425_s3, 256, %s48_s28, [#allocation6], %s4747_s13, %s4747_s13, %s4748_s14  }
  0x35   :  { %s4693_s20 = scalar_lea.hbm %s5426_s4, 512 }
  0x36   :  { %p4694_p10 = scmp.ne.s32.totalorder %s5426_s4, %s4693_s20  ;;  %p4697_p11 = scmp.lt.u32.totalorder %s4693_s20, %s5426_s4 }
  0x38   :  { %p4699_p12 = pnand %p4697_p11, %p4694_p10 }
  0x3a   :  { %4702 = shalt.err (!%p4699_p12)
}
  0x3b   :  { %s4703_s2 = scalar_lea.vmem %s4833_s30, 512  ;;  %p4708_p0 = scmp.lt.s32.totalorder %s4833_s30, %s4833_s30 }
  0x3c   :  { %p4704_p13 = scmp.ne.s32.totalorder %s4833_s30, %s4703_s2  ;;  %p4709_p1 = scmp.lt.s32.totalorder %s4703_s2, %s4703_s2 }
  0x3e   :  { %p4710_p2 = por %p4709_p1, %p4708_p0 }
  0x40   :  { %p4711_p3 = pnand %p4710_p2, %p4704_p13 }
  0x42   :  { %4714 = shalt.err (!%p4711_p3)
}
  0x43   :  { %65 = dma.hbm_to_vmem [thread:$0]  %s5426_s4, 512, %s4833_s30, [#allocation9], %s4747_s13, %s4747_s13, %s4748_s14  }
  0x44   :  { %4737 = dma.done.wait [#allocation3], 256  }
  0x45   :  { %4738 = vsyncadd [#allocation3], 4294967040 }
  0x46   :  { %4739 = dma.done.wait [#allocation6], 512  }
  0x47   :  { %4740 = vsyncadd [#allocation6], 4294966784 }
  0x48   :  { %4741 = dma.done.wait [#allocation9], 512  }
  0x49   :  { %4742 = vsyncadd [#allocation9], 4294966784  ;;  %v82_v0 = vld [vmem:[#allocation2] sm:$0xff]  ;;  %v83_v1 = vld [vmem:[#allocation2 + $0x8] sm:$0xff]  ;;  %v4751_v33 = vmov 0   ;;  %v4752_v50 = vmov 0.0|0.0  }
  0x4a   :  { %v84_v2 = vld [vmem:[%s5423_s1] sm:$0xff]  ;;  %v4873_v3 = vand.u32 4294901760, %v82_v0  ;;  %v4875_v4 = vand.u32 4294901760, %v83_v1  ;;  %v85_v5 = vld [vmem:[%s5423_s1 + $0x8] sm:$0xff]  ;;  %v86_v13 = vld [vmem:[%s5423_s1 + $0x10] sm:$0xff]  ;;  %4510 = vset.pattern.permute.xlu0 %v4751_v33  ;;  %vm4753_vm0 = vmmov 0  }
  0x4b   :  { %v4880_v6 = vand.u32 4294901760, %v84_v2  ;;  %v4882_v7 = vand.u32 4294901760, %v85_v5  ;;  %v87_v14 = vld [vmem:[%s5423_s1 + $0x18] sm:$0xff]  ;;  %v4927_v21 = vand.u32 4294901760, %v86_v13  ;;  %v1736_v34 = vld [vmem:[%s5427_s5] sm:$0xff]  ;;  %v4754_v53 = vmov 0.0  }
  0x4c   :  { %v4886_v8 = vpack.c.bf16 %v4875_v4, %v4873_v3  ;;  %v4889_v9 = vsub.f32 %v82_v0, %v4873_v3  ;;  %v4892_v10 = vsub.f32 %v83_v1, %v4875_v4  ;;  %3878 = vmatprep.mubr.f32.mxu0 %v4873_v3  ;;  %v4929_v22 = vand.u32 4294901760, %v87_v14  ;;  %1738 = vperm.xlu0 %4510, %v1736_v34   ;;  %v5058_v59 = vld [vmem:[#allocation8 + $0x10] sm:$0xff]  ;;  %v5116_v33 = vld [vmem:[#allocation7 + $0x8] sm:$0xff]  ;;  %s4755_s0 = smov [#allocation10]  }
  0x4d   :  { %v4896_v11 = vsub.f32 %v84_v2, %v4880_v6  ;;  %v4900_v12 = vpack.c.bf16 %v4882_v7, %v4880_v6  ;;  %v4909_v15 = vsub.f32 %v85_v5, %v4882_v7  ;;  %v4952_v31 = vsub.f32 %v86_v13, %v4927_v21  ;;  %v5065_v63 = vld [vmem:[#allocation7] sm:$0xff]  ;;  %s3665_s27 = sshll.u32 %s4755_s0, 4  ;;  %s3666_s27 = int_to_ptr.vmem [resolvable:$true] %s3665_s27 }
  0x4e   :  { %4210 = vmatprep.subr.bf16.mxu1 %v4886_v8  ;;  %v4913_v16 = vand.u32 4294901760, %v4889_v9  ;;  %v4916_v17 = vand.u32 4294901760, %v4892_v10  ;;  %v4217_v28 = vpack.c.bf16 %v4892_v10, %v4889_v9  ;;  %v4947_v29 = vpack.c.bf16 %v4929_v22, %v4927_v21  ;;  %s4715_s17 = scalar_lea.vmem %s3666_s27, 16  ;;  %s4719_s18 = scalar_lea.vmem %s3666_s27, 32 }
  0x4f   :  { %4212 = vmatpush3.bf16.xpose.msra.mxu1 %v4886_v8  ;;  %v4920_v18 = vand.u32 4294901760, %v4896_v11  ;;  %v4932_v23 = vand.u32 4294901760, %v4909_v15  ;;  %v4955_v32 = vsub.f32 %v87_v14, %v4929_v22  ;;  %v4964_v37 = vand.u32 4294901760, %v4952_v31  ;;  %p4716_p4 = scmp.ne.s32.totalorder %s3666_s27, %s4715_s17  ;;  %p4720_p5 = scmp.lt.s32.totalorder %s3666_s27, %s3666_s27 }
  0x50   :  { %v160_v19 = vsub.f32 %v4889_v9, %v4913_v16  ;;  %v170_v20 = vsub.f32 %v4892_v10, %v4916_v17  ;;  %4234 = vmatprep.subr.bf16.mxu1 %v4900_v12  ;;  %v4225_v44 = vpack.c.bf16 %v4916_v17, %v4913_v16  ;;  %v4249_v46 = vpack.c.bf16 %v4909_v15, %v4896_v11  ;;  %p4721_p6 = scmp.lt.s32.totalorder %s4719_s18, %s4715_s17 }
  0x51   :  { %v664_v26 = vsub.f32 %v4896_v11, %v4920_v18  ;;  %v674_v30 = vsub.f32 %v4909_v15, %v4932_v23  ;;  %v4967_v38 = vand.u32 4294901760, %v4955_v32  ;;  %v684_v40 = vsub.f32 %v4952_v31, %v4964_v37 }
  0x52   :  { %v4934_v24 = vand.u32 4294901760, %v160_v19  ;;  %v4936_v25 = vand.u32 4294901760, %v170_v20  ;;  %v4253_v47 = vpack.c.bf16 %v4955_v32, %v4952_v31  ;;  %v4265_v48 = vpack.c.bf16 %v4932_v23, %v4920_v18  ;;  %v5097_v20 = vld [vmem:[#allocation8] sm:$0xff]  ;;  %p4722_p7 = por %p4721_p6, %p4720_p5 }
  0x53   :  { %v665_v35 = vand.u32 4294901760, %v664_v26  ;;  %v675_v36 = vand.u32 4294901760, %v674_v30  ;;  %v694_v41 = vsub.f32 %v4955_v32, %v4967_v38  ;;  %v685_v42 = vand.u32 4294901760, %v684_v40 }
  0x54   :  { %3871 = vmatprep.mubr.f32.mxu1 %v4934_v24  ;;  %v4213_v27 = vpack.c.bf16 %v4936_v25, %v4934_v24  ;;  %v4269_v49 = vpack.c.bf16 %v4967_v38, %v4964_v37  ;;  %vm1750_vm1 = vcmask 130048   ;;  %vm2214_vm2 = vcmask 261120   ;;  %p4723_p8 = pnand %p4722_p7, %p4716_p4 }
  0x55   :  { %v4241_v39 = vpack.c.bf16 %v675_v36, %v665_v35  ;;  %v695_v43 = vand.u32 4294901760, %v694_v41  ;;  %v2331_v62 = vsel %vm2214_vm2, %v5058_v59, -inf  ;;  %v2244_v0 = vsel %vm1750_vm1, %v5065_v63, -inf }
  0x56   :  { %3872 = vmatmul.mubr.f32.vlgmr.msra.gmra.mrb[0].mxu1 %v4936_v25  ;;  %4214 = vmatprep.subr.bf16.mxu0 %v4213_v27  ;;  %vm2227_vm5 = vcmask 7168   ;;  %vm3657_vm6 = vcmask 0  }
  0x57   :  { %4216 = vmatpush3.bf16.xpose.msra.mxu0 %v4213_v27  ;;  %4236 = vmatpush3.bf16.xpose.msra.mxu1 %v4900_v12  ;;  %v4245_v45 = vpack.c.bf16 %v695_v43, %v685_v42 }
  0x58   :  { %4218 = vmatprep.subr.bf16.mxu0 %v4217_v28  ;;  %4238 = vmatprep.subr.bf16.mxu1 %v4947_v29 }
  0x59   :  { %3917 = vmatprep.mubr.f32.mxu1 %v665_v35 }
  0x5e   :  { %3879 = vmatmul.mubr.f32.vlgmr.msra.gmra.mrb[0].mxu0 %v4875_v4 }
  0x5f   :  { %4220 = vmatpush3.bf16.xpose.msra.mxu0 %v4217_v28  ;;  %4240 = vmatpush3.bf16.xpose.msra.mxu1 %v4947_v29 }
  0x60   :  { %3885 = vmatprep.mubr.f32.mxu0 %v4889_v9  ;;  %4222 = vmatprep.subr.bf16.mxu0 %v4886_v8 }
  0x61   :  { %4242 = vmatprep.subr.bf16.mxu1 %v4241_v39 }
  0x66   :  { %3886 = vmatmul.mubr.f32.vlgmr.msra.gmra.mrb[0].mxu0 %v4892_v10  ;;  %3918 = vmatmul.mubr.f32.vlgmr.msra.gmra.mrb[2].mxu1 %v675_v36  ;;  %v2247_v36 = vsel %vm1750_vm1, %v5116_v33, -inf }
  0x67   :  { %4224 = vmatpush3.bf16.xpose.msra.mxu0 %v4886_v8  ;;  %4244 = vmatpush3.bf16.xpose.msra.mxu1 %v4241_v39 }
  0x68   :  { %3892 = vmatprep.mubr.f32.mxu0 %v4913_v16  ;;  %4226 = vmatprep.subr.bf16.mxu0 %v4225_v44 }
  0x69   :  { %4246 = vmatprep.subr.bf16.mxu1 %v4245_v45  ;;  %3920 = vmatprep.mubr.f32.mxu1 %v685_v42 }
  0x6a   :  { %3921 = vmatmul.mubr.f32.gmra.mrb[4].mxu1 %v695_v43 }
  0x6b   :  { %3931 = vmatprep.mubr.f32.mxu1 %v4880_v6 }
  0x6e   :  { %3893 = vmatmul.mubr.f32.vlgmr.msra.gmra.mrb[0].mxu0 %v4916_v17 }
  0x6f   :  { %4228 = vmatpush3.bf16.xpose.msra.mxu0 %v4225_v44  ;;  %4248 = vmatpush3.bf16.xpose.msra.mxu1 %v4245_v45 }
  0x70   :  { %3899 = vmatprep.mubr.f32.mxu0 %v4873_v3  ;;  %4230 = vmatprep.subr.bf16.mxu0 %v4886_v8 }
  0x71   :  { %4250 = vmatprep.subr.bf16.mxu1 %v4249_v46 }
  0x76   :  { %3900 = vmatmul.mubr.f32.vlgmr.msra.gmra.mrb[0].mxu0 %v4875_v4  ;;  %3932 = vmatmul.mubr.f32.vlgmr.msra.gmra.mrb[2].mxu1 %v4882_v7 }
  0x77   :  { %4232 = vmatpush3.bf16.xpose.msra.mxu0 %v4886_v8  ;;  %4252 = vmatpush3.bf16.xpose.msra.mxu1 %v4249_v46 }
  0x78   :  { %3906 = vmatprep.mubr.f32.mxu0 %v4873_v3  ;;  %4254 = vmatprep.subr.bf16.mxu1 %v4253_v47 }
  0x79   :  { %4290 = vmatprep.subr.bf16.mxu0 %v4241_v39  ;;  %3934 = vmatprep.mubr.f32.mxu1 %v4927_v21 }
  0x7a   :  { %3935 = vmatmul.mubr.f32.gmra.mrb[4].mxu1 %v4929_v22 }
  0x7b   :  { %3945 = vmatprep.mubr.f32.mxu1 %v4896_v11 }
  0x7e   :  { %3907 = vmatmul.mubr.f32.vlgmr.msra.gmra.mrb[0].mxu0 %v4875_v4 }
  0x7f   :  { %4256 = vmatpush3.bf16.xpose.msra.mxu1 %v4253_v47  ;;  %4292 = vmatpush3.bf16.xpose.msra.mxu0 %v4241_v39 }
  0x80   :  { %4258 = vmatprep.subr.bf16.mxu1 %v4900_v12  ;;  %4294 = vmatprep.subr.bf16.mxu0 %v4245_v45 }
  0x81   :  { %4012 = vmatprep.mubr.f32.mxu0 %v4873_v3 }
  0x86   :  { %3946 = vmatmul.mubr.f32.vlgmr.msra.gmra.mrb[2].mxu1 %v4909_v15 }
  0x87   :  { %4260 = vmatpush3.bf16.xpose.msra.mxu1 %v4900_v12  ;;  %4296 = vmatpush3.bf16.xpose.msra.mxu0 %v4245_v45 }
  0x88   :  { %4262 = vmatprep.subr.bf16.mxu1 %v4947_v29  ;;  %4298 = vmatprep.subr.bf16.mxu0 %v4249_v46 }
  0x89   :  { %3948 = vmatprep.mubr.f32.mxu1 %v4952_v31 }
  0x8a   :  { %3949 = vmatmul.mubr.f32.gmra.mrb[4].mxu1 %v4955_v32 }
  0x8b   :  { %3959 = vmatprep.mubr.f32.mxu1 %v4920_v18 }
  0x8e   :  { %4013 = vmatmul.mubr.f32.vlgmr.msra.gmra.mrb[2].mxu0 %v4875_v4 }
  0x8f   :  { %4264 = vmatpush3.bf16.xpose.msra.mxu1 %v4947_v29  ;;  %4300 = vmatpush3.bf16.xpose.msra.mxu0 %v4249_v46 }
  0x90   :  { %4266 = vmatprep.subr.bf16.mxu1 %v4265_v48  ;;  %4302 = vmatprep.subr.bf16.mxu0 %v4253_v47 }
  0x91   :  { %4023 = vmatprep.mubr.f32.mxu0 %v4889_v9 }
  0x96   :  { %3960 = vmatmul.mubr.f32.vlgmr.msra.gmra.mrb[2].mxu1 %v4932_v23  ;;  %v2325_v23 = vsel %vm2214_vm2, %v5097_v20, -inf }
  0x97   :  { %4268 = vmatpush3.bf16.xpose.msra.mxu1 %v4265_v48  ;;  %4304 = vmatpush3.bf16.xpose.msra.mxu0 %v4253_v47 }
  0x98   :  { %4270 = vmatprep.subr.bf16.mxu1 %v4269_v49  ;;  %4306 = vmatprep.subr.bf16.mxu0 %v4900_v12 }
  0x99   :  { %3962 = vmatprep.mubr.f32.mxu1 %v4964_v37 }
  0x9a   :  { %3963 = vmatmul.mubr.f32.gmra.mrb[4].mxu1 %v4967_v38 }
  0x9b   :  { %3973 = vmatprep.mubr.f32.mxu1 %v4880_v6 }
  0x9e   :  { %4024 = vmatmul.mubr.f32.vlgmr.msra.gmra.mrb[2].mxu0 %v4892_v10  ;;  %v1734_v10 = vlaneseq }
  0x9f   :  { %4272 = vmatpush3.bf16.xpose.msra.mxu1 %v4269_v49  ;;  %4308 = vmatpush3.bf16.xpose.msra.mxu0 %v4900_v12 }
  0xa0   :  { %4274 = vmatprep.subr.bf16.mxu1 %v4900_v12  ;;  %4310 = vmatprep.subr.bf16.mxu0 %v4947_v29  ;;  %v5090_v15 = vand.u32 127, %v1734_v10 }
  0xa1   :  { %4034 = vmatprep.mubr.f32.mxu0 %v4913_v16 }
  0xa6   :  { %3974 = vmatmul.mubr.f32.vlgmr.msra.gmra.mrb[2].mxu1 %v4882_v7 }
  0xa7   :  { %4276 = vmatpush3.bf16.xpose.msra.mxu1 %v4900_v12  ;;  %4312 = vmatpush3.bf16.xpose.msra.mxu0 %v4947_v29 }
  0xa8   :  { %4278 = vmatprep.subr.bf16.mxu1 %v4947_v29  ;;  %4314 = vmatprep.subr.bf16.mxu0 %v4265_v48 }
  0xa9   :  { %3976 = vmatprep.mubr.f32.mxu1 %v4927_v21 }
  0xaa   :  { %3977 = vmatmul.mubr.f32.gmra.mrb[4].mxu1 %v4929_v22 }
  0xab   :  { %3987 = vmatprep.mubr.f32.mxu1 %v4880_v6 }
  0xae   :  { %4035 = vmatmul.mubr.f32.vlgmr.msra.gmra.mrb[2].mxu0 %v4916_v17 }
  0xaf   :  { %4280 = vmatpush3.bf16.xpose.msra.mxu1 %v4947_v29  ;;  %4316 = vmatpush3.bf16.xpose.msra.mxu0 %v4265_v48 }
  0xb0   :  { %4318 = vmatprep.subr.bf16.mxu0 %v4269_v49  ;;  %4282 = vmatprep.subr.bf16.mxu1 %v4900_v12 }
  0xb1   :  { %4045 = vmatprep.mubr.f32.mxu0 %v4873_v3 }
  0xb6   :  { %3988 = vmatmul.mubr.f32.vlgmr.msra.gmra.mrb[2].mxu1 %v4882_v7 }
  0xb7   :  { %4320 = vmatpush3.bf16.xpose.msra.mxu0 %v4269_v49  ;;  %3990 = vmatprep.mubr.f32.mxu1 %v4927_v21 }
  0xb8   :  { %4322 = vmatprep.subr.bf16.mxu0 %v4900_v12  ;;  %4284 = vmatpush3.bf16.xpose.msra.mxu1 %v4900_v12 }
  0xb9   :  { %4286 = vmatprep.subr.bf16.mxu1 %v4947_v29 }
  0xba   :  { %3991 = vmatmul.mubr.f32.gmra.mrb[4].mxu1 %v4929_v22 }
  0xbb   :  { %4001 = vmatprep.mubr.f32.mxu1 %v4934_v24 }
  0xbe   :  { %4046 = vmatmul.mubr.f32.vlgmr.msra.gmra.mrb[2].mxu0 %v4875_v4 }
  0xbf   :  { %4324 = vmatpush3.bf16.xpose.msra.mxu0 %v4900_v12  ;;  %4056 = vmatprep.mubr.f32.mxu0 %v4873_v3 }
  0xc0   :  { %4326 = vmatprep.subr.bf16.mxu0 %v4947_v29  ;;  %4288 = vmatpush3.bf16.xpose.msra.mxu1 %v4947_v29 }
  0xc1   :  { %4329 = vmatprep.subr.bf16.mxu1 %v4752_v50 }
  0xc7   :  { %4328 = vmatpush3.bf16.xpose.msra.mxu0 %v4947_v29  ;;  %4002 = vmatmul.mubr.f32.vlgmr.msra.gmra.mrb[6].mxu1 %v4936_v25  ;;  %v5107_v25 = vld [vmem:[#allocation8 + $0x8] sm:$0xff] }
  0xc8   :  { %4063 = vmatprep.mubr.msk.f32.mxu1 %vm4753_vm0, %v4754_v53  ;;  %v2328_v30 = vsel %vm2214_vm2, %v5107_v25, -inf }
  0xcb   :  { %v1739_v16 = vpop.permute.xlu0 %1738 }
  0xcc   :  { %vm1740_vm3 = vcmp.eq.s32.totalorder %v5090_v15, %v1739_v16 }
  0xcd   :  { %v5102_v22 = vsel %vm1740_vm3, 1.0, %v4754_v53 }
  0xce   :  { %4057 = vmatmul.mubr.f32.vlgmr.msra.gmra.mrb[2].mxu0 %v4875_v4  ;;  %v5071_v4 = vld [vmem:[#allocation8 + $0x18] sm:$0xff]  ;;  %v1752_v26 = vsel %vm1750_vm1, %v5102_v22, 0 }
  0xcf   :  { %v2334_v6 = vsel %vm2214_vm2, %v5071_v4, -inf  ;;  %v5113_v31 = vsub.f32 %v1752_v26, %v1752_v26 }
  0xd1   :  { %v1823_v37 = vand.u32 4294901760, %v5113_v31 }
  0xd3   :  { %v1824_v46 = vsub.f32 %v5113_v31, %v1823_v37 }
 0x129   :  { %v3873_v51 = vpop.f32.mrb[0].mxu1 }
 0x12a   :  { %v163_v52 = vpop.f32.mrb[1].mxu1 }
 0x151   :  { %v3908_v54 = vpop.f32.mrb[0].mxu0 }
 0x152   :  { %v5052_v55 = vadd.f32 %v3908_v54, %v3873_v51  ;;  %v582_v56 = vpop.f32.mrb[1].mxu0 }
 0x153   :  { %v5054_v57 = vadd.f32 %v582_v56, %v163_v52 }
 0x154   :  { %v2501_v58 = vsel %vm1750_vm1, %v5052_v55, 0.0  ;;  %v2273_v11 = vmul.f32 0.5, %v5052_v55 }
 0x155   :  { %v2272_v60 = vmul.f32 0.5, %v5054_v57  ;;  %2502 = vadd.xlane.f32.xlu1 %v2501_v58  ;;  %v2498_v61 = vsel %vm1750_vm1, %v5054_v57, 0.0 }
 0x156   :  { %2499 = vadd.xlane.f32.xlu0 %v2498_v61  ;;  %v1825_v61 = vand.u32 4294901760, %v1824_v46 }
 0x157   :  { %4511 = vtanh.f32 %v2272_v60 }
 0x158   :  { %4513 = vtanh.f32 %v2273_v11 }
 0x15a   :  { %2332 = vmax.xlane.f32.xlu0 %v2331_v62 }
 0x15e   :  { %2245 = vmax.xlane.f32.xlu0 %v2244_v0 }
 0x161   :  { %v4512_v1 = vpop.eup %4511 }
 0x162   :  { %v2276_v2 = vmul.f32 0.5, %v4512_v1  ;;  %v4514_v28 = vpop.eup %4513 }
 0x163   :  { %v2277_v34 = vmul.f32 0.5, %v4514_v28 }
 0x164   :  { %v5069_v3 = vadd.f32 0.5, %v2276_v2 }
 0x165   :  { %v5123_v41 = vadd.f32 0.5, %v2277_v34 }
 0x166   :  { %v2280_v5 = vsel %vm1750_vm1, %v5069_v3, -inf }
 0x167   :  { %2281 = vmax.xlane.f32.xlu0 %v2280_v5  ;;  %v2283_v51 = vsel %vm1750_vm1, %v5123_v41, -inf }
 0x16b   :  { %2335 = vmax.xlane.f32.xlu0 %v2334_v6 }
 0x189   :  { %v5077_v7 = vpop.f32.mrb[2].mxu1 }
 0x18a   :  { %v5079_v8 = vpop.f32.mrb[3].mxu1  ;;  %v3060_v9 = vsel %vm2214_vm2, %v5077_v7, 0.0  ;;  %v2382_v17 = vmul.f32 0.5, %v5077_v7 }
 0x18b   :  { %3061 = vadd.xlane.f32.xlu1 %v3060_v9  ;;  %v3057_v14 = vsel %vm2214_vm2, %v5079_v8, 0.0  ;;  %v2381_v19 = vmul.f32 0.5, %v5079_v8 }
 0x18c   :  { %4515 = vtanh.f32 %v2382_v17 }
 0x18d   :  { %v5084_v12 = vpop.f32.mrb[4].mxu1  ;;  %4517 = vtanh.f32 %v2381_v19  ;;  %v88_v19 = vld [vmem:[#allocation5] sm:$0xff] }
 0x18e   :  { %v5086_v13 = vpop.f32.mrb[5].mxu1  ;;  %v3066_v21 = vsel %vm2214_vm2, %v5084_v12, 0.0  ;;  %v2384_v24 = vmul.f32 0.5, %v5084_v12 }
 0x18f   :  { %3058 = vadd.xlane.f32.xlu1 %v3057_v14  ;;  %v3063_v18 = vsel %vm2214_vm2, %v5086_v13, 0.0  ;;  %v2383_v32 = vmul.f32 0.5, %v5086_v13 }
 0x190   :  { %4519 = vtanh.f32 %v2384_v24 }
 0x191   :  { %4521 = vtanh.f32 %v2383_v32 }
 0x193   :  { %3064 = vadd.xlane.f32.xlu1 %v3063_v18 }
 0x196   :  { %v4516_v35 = vpop.eup %4515 }
 0x197   :  { %3067 = vadd.xlane.f32.xlu1 %v3066_v21  ;;  %v2390_v42 = vmul.f32 0.5, %v4516_v35  ;;  %v4518_v43 = vpop.eup %4517 }
 0x198   :  { %v2389_v54 = vmul.f32 0.5, %v4518_v43 }
 0x199   :  { %v5137_v52 = vadd.f32 0.5, %v2390_v42 }
 0x19a   :  { %v4003_v27 = vpop.f32.mrb[6].mxu1  ;;  %v4520_v56 = vpop.eup %4519  ;;  %v5145_v2 = vadd.f32 0.5, %v2389_v54 }
 0x19b   :  { %2326 = vmax.xlane.f32.xlu1 %v2325_v23  ;;  %v1281_v29 = vpop.f32.mrb[7].mxu1  ;;  %v2400_v1 = vsel %vm2214_vm2, %v5137_v52, -inf  ;;  %v2392_v6 = vmul.f32 0.5, %v4520_v56  ;;  %v4522_v9 = vpop.eup %4521  ;;  %v3078_v23 = vsel %vm2214_vm2, %v88_v19, 0 }
 0x19c   :  { %v2397_v16 = vsel %vm2214_vm2, %v5145_v2, -inf  ;;  %v2391_v18 = vmul.f32 0.5, %v4522_v9  ;;  %v5155_v24 = vand.u32 4294901760, %v3078_v23 }
 0x19d   :  { %v5152_v17 = vadd.f32 0.5, %v2392_v6 }
 0x19e   :  { %v5159_v28 = vadd.f32 0.5, %v2391_v18 }
 0x19f   :  { %2329 = vmax.xlane.f32.xlu1 %v2328_v30 }
 0x1a0   :  { %v2403_v32 = vsel %vm2214_vm2, %v5159_v28, -inf }
 0x1a1   :  { %v4058_v38 = vpop.f32.mrb[2].mxu0 }
 0x1a2   :  { %v5121_v39 = vadd.f32 %v4058_v38, %v4003_v27  ;;  %v1724_v40 = vpop.f32.mrb[3].mxu0  ;;  %v2406_v27 = vsel %vm2214_vm2, %v5152_v17, -inf  ;;  %v5178_v38 = vld [vmem:[#allocation5 + $0x8] sm:$0xff] }
 0x1a3   :  { %v5125_v44 = vadd.f32 %v1724_v40, %v1281_v29  ;;  %2248 = vmax.xlane.f32.xlu1 %v2247_v36  ;;  %v5163_v29 = vsub.f32 %v3078_v23, %v5155_v24  ;;  %v2515_v40 = vand.u32 4294901760, %v88_v19  ;;  %v2518_v42 = vand.u32 4294901760, %v5178_v38 }
 0x1a4   :  { %v1758_v45 = vand.u32 4294901760, %v5121_v39  ;;  %v2473_v35 = vsel %vm2214_vm2, %v5121_v39, -inf }
 0x1a5   :  { %v1755_v47 = vand.u32 4294901760, %v5125_v44  ;;  %v2470_v48 = vsel %vm2214_vm2, %v5125_v44, -inf  ;;  %v3154_v30 = vand.u32 4294901760, %v5163_v29  ;;  %v2610_v46 = vsub.f32 %v5178_v38, %v2518_v42 }
 0x1a6   :  { %v1840_v49 = vsub.f32 %v5121_v39, %v1758_v45  ;;  %2471 = vmax.xlane.f32.xlu0 %v2470_v48 }
 0x1a7   :  { %v1833_v58 = vsub.f32 %v5125_v44, %v1755_v47  ;;  %2284 = vmax.xlane.f32.xlu1 %v2283_v51  ;;  %v5140_v60 = vpack.c.bf16 %v1758_v45, %v1755_v47  ;;  %v3155_v34 = vsub.f32 %v5163_v29, %v3154_v30  ;;  %v2603_v45 = vsub.f32 %v88_v19, %v2515_v40 }
 0x1a8   :  { %v1841_v62 = vand.u32 4294901760, %v1840_v49  ;;  %v2611_v48 = vand.u32 4294901760, %v2610_v46 }
 0x1a9   :  { %4331 = vmatpush3.bf16.msra.mxu1 %v5140_v60  ;;  %v1834_v0 = vand.u32 4294901760, %v1833_v58  ;;  %v4336_v26 = vpack.c.bf16 %v1840_v49, %v1833_v58  ;;  %v3156_v36 = vand.u32 4294901760, %v3155_v34  ;;  %v2604_v47 = vand.u32 4294901760, %v2603_v45 }
 0x1aa   :  { %4332 = vmatprep.subr.bf16.mxu1 %v4752_v50  ;;  %v1842_v5 = vsub.f32 %v1840_v49, %v1841_v62  ;;  %v4347_v49 = vpack.c.bf16 %v2518_v42, %v2515_v40  ;;  %v2612_v54 = vsub.f32 %v2610_v46, %v2611_v48  ;;  %v4355_v23 = vpack.c.bf16 %v2610_v46, %v2603_v45 }
 0x1ab   :  { %2401 = vmax.xlane.f32.xlu1 %v2400_v1  ;;  %v1835_v10 = vsub.f32 %v1833_v58, %v1834_v0  ;;  %4151 = vmatprep.mubr.f32.mxu0 %v3156_v36  ;;  %v4342_v43 = vpack.c.bf16 %v1841_v62, %v1834_v0  ;;  %v2605_v51 = vsub.f32 %v2603_v45, %v2604_v47 }
 0x1ac   :  { %4064 = vmatmul.mubr.f32.vlgmr.msra.gmra.mrb[8].mxu1 %v1825_v61  ;;  %v1843_v11 = vand.u32 4294901760, %v1842_v5 }
 0x1ad   :  { %v1836_v14 = vand.u32 4294901760, %v1835_v10  ;;  %4070 = vmatprep.mubr.msk.f32.mxu1 %vm4753_vm0, %v4754_v53 }
 0x1af   :  { %2398 = vmax.xlane.f32.xlu1 %v2397_v16  ;;  %v4333_v21 = vpack.c.bf16 %v1843_v11, %v1836_v14 }
 0x1b1   :  { %4334 = vmatpush3.bf16.msra.mxu1 %v4333_v21 }
 0x1b2   :  { %4335 = vmatprep.subr.bf16.mxu1 %v4752_v50 }
 0x1b3   :  { %2407 = vmax.xlane.f32.xlu1 %v2406_v27 }
 0x1b4   :  { %4071 = vmatmul.mubr.msk.f32.vlgmr.msra.gmra.mrb[8].mxu1 %vm1750_vm1, %v5102_v22 }
 0x1b5   :  { %4337 = vmatpush3.bf16.msra.mxu1 %v4336_v26  ;;  %4077 = vmatprep.mubr.msk.f32.mxu1 %vm4753_vm0, %v4754_v53 }
 0x1b6   :  { %4338 = vmatprep.subr.bf16.mxu1 %v4752_v50 }
 0x1b7   :  { %2404 = vmax.xlane.f32.xlu1 %v2403_v32  ;;  %v3081_v32 = vsel %vm2214_vm2, %v5178_v38, 0 }
 0x1b8   :  { %v5206_v40 = vand.u32 4294901760, %v3081_v32 }
 0x1bb   :  { %2474 = vmax.xlane.f32.xlu1 %v2473_v35 }
 0x1bc   :  { %4078 = vmatmul.mubr.f32.vlgmr.msra.gmra.mrb[8].mxu1 %v5113_v31  ;;  %v2606_v31 = vand.u32 4294901760, %v2605_v51 }
 0x1bd   :  { %4340 = vmatpush3.bf16.msra.mxu1 %v5140_v60  ;;  %4084 = vmatprep.mubr.msk.f32.mxu1 %vm4753_vm0, %v4754_v53 }
 0x1be   :  { %4341 = vmatprep.subr.bf16.mxu1 %v4752_v50 }
 0x1c4   :  { %4085 = vmatmul.mubr.f32.vlgmr.msra.gmra.mrb[8].mxu1 %v1823_v37  ;;  %v2613_v37 = vand.u32 4294901760, %v2612_v54 }
 0x1c5   :  { %4343 = vmatpush3.bf16.msra.mxu1 %v4342_v43  ;;  %4091 = vmatprep.mubr.msk.f32.mxu1 %vm4753_vm0, %v4754_v53 }
 0x1c6   :  { %4344 = vmatprep.subr.bf16.mxu1 %v4752_v50  ;;  %v4351_v56 = vpack.c.bf16 %v2613_v37, %v2606_v31 }
 0x1cc   :  { %4092 = vmatmul.mubr.msk.f32.vlgmr.msra.gmra.mrb[8].mxu1 %vm1750_vm1, %v5102_v22 }
 0x1cd   :  { %4346 = vmatpush3.bf16.msra.mxu1 %v5140_v60  ;;  %4098 = vmatprep.mubr.msk.f32.mxu1 %vm4753_vm0, %v4754_v53 }
 0x1ce   :  { %4348 = vmatprep.subr.bf16.mxu1 %v4347_v49 }
 0x1d4   :  { %4099 = vmatmul.mubr.msk.f32.vlgmr.msra.gmra.mrb[8].mxu1 %vm1750_vm1, %v5102_v22 }
 0x1d5   :  { %4350 = vmatpush3.bf16.msra.mxu1 %v4347_v49 }
 0x1d6   :  { %4352 = vmatprep.subr.bf16.mxu1 %v4351_v56 }
 0x1e2   :  { %v2503_v50 = vpop.xlane.xlu1 %2502 }
 0x1e3   :  { %4523 = vrcp.f32 %v2503_v50  ;;  %v2500_v58 = vpop.xlane.xlu0 %2499 }
 0x1e4   :  { %4525 = vrcp.f32 %v2500_v58 }
 0x1ed   :  { %v4524_v61 = vpop.eup %4523 }
 0x1ee   :  { %v4526_v62 = vpop.eup %4525  ;;  %v2507_v60 = vmul.f32 %v4524_v61, %v5052_v55  ;;  %v4363_v55 = vpack.c.bf16 %v2611_v48, %v2604_v47  ;;  %v3163_v47 = vsub.f32 %v3081_v32, %v5206_v40 }
 0x1ef   :  { %v2505_v0 = vmul.f32 %v4526_v62, %v5054_v57 }
 0x1f0   :  { %v2512_v1 = vsel %vm1750_vm1, %v2507_v60, 0 }
 0x1f1   :  { %v2509_v5 = vsel %vm1750_vm1, %v2505_v0, 0  ;;  %v2591_v6 = vand.u32 4294901760, %v2512_v1 }
 0x1f2   :  { %v2581_v9 = vand.u32 4294901760, %v2509_v5 }
 0x1f3   :  { %v2592_v10 = vsub.f32 %v2512_v1, %v2591_v6 }
 0x1f4   :  { %v2582_v22 = vsub.f32 %v2509_v5, %v2581_v9 }
 0x1f5   :  { %v2593_v11 = vand.u32 4294901760, %v2592_v10 }
 0x1f6   :  { %v2583_v14 = vand.u32 4294901760, %v2582_v22 }
 0x1f7   :  { %v2594_v16 = vsub.f32 %v2592_v10, %v2593_v11 }
 0x1f8   :  { %v2584_v18 = vsub.f32 %v2582_v22, %v2583_v14 }
 0x1f9   :  { %v2595_v21 = vand.u32 4294901760, %v2594_v16 }
 0x1fa   :  { %v2585_v19 = vand.u32 4294901760, %v2584_v18 }
 0x1fc   :  { %4105 = vmatprep.mubr.f32.mxu1 %v2585_v19 }
 0x1fd   :  { %4106 = vmatmul.mubr.f32.vlgmr.msra.gmra.mrb[10].mxu1 %v2595_v21 }
 0x1fe   :  { %4112 = vmatprep.mubr.f32.mxu1 %v2581_v9  ;;  %4354 = vmatpush3.bf16.msra.mxu1 %v4351_v56 }
 0x1ff   :  { %4356 = vmatprep.subr.bf16.mxu1 %v4355_v23 }
 0x205   :  { %4113 = vmatmul.mubr.f32.vlgmr.msra.gmra.mrb[10].mxu1 %v2591_v6 }
 0x206   :  { %4119 = vmatprep.mubr.f32.mxu1 %v2582_v22  ;;  %4358 = vmatpush3.bf16.msra.mxu1 %v4355_v23 }
 0x207   :  { %4360 = vmatprep.subr.bf16.mxu1 %v4347_v49 }
 0x20d   :  { %4120 = vmatmul.mubr.f32.vlgmr.msra.gmra.mrb[10].mxu1 %v2592_v10 }
 0x20e   :  { %4126 = vmatprep.mubr.f32.mxu1 %v2583_v14  ;;  %4362 = vmatpush3.bf16.msra.mxu1 %v4347_v49 }
 0x20f   :  { %4364 = vmatprep.subr.bf16.mxu1 %v4363_v55 }
 0x215   :  { %4127 = vmatmul.mubr.f32.vlgmr.msra.gmra.mrb[10].mxu1 %v2593_v11 }
 0x216   :  { %4133 = vmatprep.mubr.f32.mxu1 %v2581_v9  ;;  %4366 = vmatpush3.bf16.msra.mxu1 %v4363_v55 }
 0x217   :  { %4368 = vmatprep.subr.bf16.mxu1 %v4347_v49 }
 0x218   :  { %v3062_v57 = vpop.xlane.xlu1 %3061 }
 0x219   :  { %4527 = vrcp.f32 %v3062_v57 }
 0x21c   :  { %v3059_v26 = vpop.xlane.xlu1 %3058 }
 0x21d   :  { %4529 = vrcp.f32 %v3059_v26  ;;  %4134 = vmatmul.mubr.f32.vlgmr.msra.gmra.mrb[10].mxu1 %v2591_v6 }
 0x21e   :  { %4140 = vmatprep.mubr.f32.mxu1 %v2581_v9  ;;  %4370 = vmatpush3.bf16.msra.mxu1 %v4347_v49 }
 0x220   :  { %v3065_v27 = vpop.xlane.xlu1 %3064 }
 0x221   :  { %4531 = vrcp.f32 %v3065_v27 }
 0x223   :  { %v4528_v34 = vpop.eup %4527 }
 0x224   :  { %v3072_v35 = vmul.f32 %v4528_v34, %v5077_v7  ;;  %v3068_v36 = vpop.xlane.xlu1 %3067  ;;  %v3164_v7 = vand.u32 4294901760, %v3163_v47 }
 0x225   :  { %4533 = vrcp.f32 %v3068_v36  ;;  %4141 = vmatmul.mubr.f32.vlgmr.msra.gmra.mrb[10].mxu1 %v2591_v6 }
 0x226   :  { %v3087_v42 = vand.u32 4294901760, %v3072_v35  ;;  %v3165_v9 = vsub.f32 %v3163_v47, %v3164_v7 }
 0x227   :  { %v4530_v43 = vpop.eup %4529 }
 0x228   :  { %v3070_v45 = vmul.f32 %v4530_v43, %v5079_v8  ;;  %v3181_v46 = vsub.f32 %v3072_v35, %v3087_v42  ;;  %v3166_v14 = vand.u32 4294901760, %v3165_v9  ;;  %v2327_v35 = vpop.xlane.xlu1 %2326 }
 0x22a   :  { %v3084_v48 = vand.u32 4294901760, %v3070_v45  ;;  %v3182_v49 = vand.u32 4294901760, %v3181_v46 }
 0x22b   :  { %v4532_v51 = vpop.eup %4531 }
 0x22c   :  { %v4371_v54 = vpack.c.bf16 %v3087_v42, %v3084_v48  ;;  %v3074_v38 = vmul.f32 %v4532_v51, %v5086_v13  ;;  %v3174_v31 = vsub.f32 %v3070_v45, %v3084_v48  ;;  %v3183_v50 = vsub.f32 %v3181_v46, %v3182_v49  ;;  %v2330_v36 = vpop.xlane.xlu1 %2329 }
 0x22e   :  { %v3090_v37 = vand.u32 4294901760, %v3074_v38  ;;  %4372 = vmatprep.subr.bf16.mxu0 %v4371_v54  ;;  %v3175_v56 = vand.u32 4294901760, %v3174_v31  ;;  %v4387_v58 = vpack.c.bf16 %v3181_v46, %v3174_v31  ;;  %v3184_v6 = vand.u32 4294901760, %v3183_v50 }
 0x22f   :  { %v4534_v61 = vpop.eup %4533  ;;  %4374 = vmatpush3.bf16.msra.mxu0 %v4371_v54 }
 0x230   :  { %v3076_v8 = vmul.f32 %v4534_v61, %v5084_v12  ;;  %v3176_v62 = vsub.f32 %v3174_v31, %v3175_v56  ;;  %v3188_v60 = vsub.f32 %v3074_v38, %v3090_v37  ;;  %v4403_v0 = vpack.c.bf16 %v3182_v49, %v3175_v56  ;;  %v1743_v49 = vld [vmem:[%s5428_s6] sm:$0xff] }
 0x232   :  { %v3093_v1 = vand.u32 4294901760, %v3076_v8  ;;  %v3177_v5 = vand.u32 4294901760, %v3176_v62  ;;  %v3189_v10 = vand.u32 4294901760, %v3188_v60 }
 0x234   :  { %v4375_v13 = vpack.c.bf16 %v3093_v1, %v3090_v37  ;;  %v4379_v22 = vpack.c.bf16 %v3184_v6, %v3177_v5  ;;  %v3195_v11 = vsub.f32 %v3076_v8, %v3093_v1  ;;  %v3190_v16 = vsub.f32 %v3188_v60, %v3189_v10  ;;  %v2333_v1 = vpop.xlane.xlu0 %2332 }
 0x236   :  { %4376 = vmatprep.subr.bf16.mxu0 %v4375_v13  ;;  %v3196_v18 = vand.u32 4294901760, %v3195_v11  ;;  %v4391_v19 = vpack.c.bf16 %v3195_v11, %v3188_v60  ;;  %v3191_v23 = vand.u32 4294901760, %v3190_v16 }
 0x237   :  { %4378 = vmatpush3.bf16.msra.mxu0 %v4375_v13 }
 0x238   :  { %4380 = vmatprep.subr.bf16.mxu0 %v4379_v22  ;;  %v3197_v21 = vsub.f32 %v3195_v11, %v3196_v18  ;;  %v4407_v12 = vpack.c.bf16 %v3196_v18, %v3189_v10  ;;  %v2246_v5 = vpop.xlane.xlu0 %2245  ;;  %v5260_v10 = vsub.f32 %v5097_v20, %v2327_v35 }
 0x23a   :  { %4152 = vmatmul.mubr.f32.vlgmr.msra.gmra.mrb[4].mxu0 %v3166_v14  ;;  %v3198_v55 = vand.u32 4294901760, %v3197_v21  ;;  %v5266_v14 = vsub.f32 %v5107_v25, %v2330_v36 }
 0x23b   :  { %4382 = vmatpush3.bf16.msra.mxu0 %v4379_v22  ;;  %4162 = vmatprep.mubr.f32.mxu0 %v5155_v24  ;;  %v2341_v22 = vmul.f32 1.442695, %v5260_v10 }
 0x23c   :  { %v4383_v57 = vpack.c.bf16 %v3198_v55, %v3191_v23  ;;  %v2282_v6 = vpop.xlane.xlu0 %2281  ;;  %v2343_v21 = vmul.f32 1.442695, %v5266_v14 }
 0x23e   :  { %4384 = vmatprep.subr.bf16.mxu0 %v4383_v57 }
 0x23f   :  { %4386 = vmatpush3.bf16.msra.mxu0 %v4383_v57 }
 0x240   :  { %4388 = vmatprep.subr.bf16.mxu0 %v4387_v58  ;;  %v2336_v9 = vpop.xlane.xlu0 %2335 }
 0x242   :  { %4163 = vmatmul.mubr.f32.vlgmr.msra.gmra.mrb[4].mxu0 %v5206_v40 }
 0x243   :  { %4390 = vmatpush3.bf16.msra.mxu0 %v4387_v58  ;;  %4173 = vmatprep.mubr.f32.mxu0 %v5163_v29 }
 0x244   :  { %4392 = vmatprep.subr.bf16.mxu0 %v4391_v19 }
 0x247   :  { %4394 = vmatpush3.bf16.msra.mxu0 %v4391_v19 }
 0x248   :  { %4396 = vmatprep.subr.bf16.mxu0 %v4371_v54 }
 0x24a   :  { %4174 = vmatmul.mubr.f32.vlgmr.msra.gmra.mrb[4].mxu0 %v3163_v47 }
 0x24b   :  { %4398 = vmatpush3.bf16.msra.mxu0 %v4371_v54  ;;  %4184 = vmatprep.mubr.f32.mxu0 %v3154_v30 }
 0x24c   :  { %4400 = vmatprep.subr.bf16.mxu0 %v4375_v13 }
 0x24f   :  { %4402 = vmatpush3.bf16.msra.mxu0 %v4375_v13 }
 0x250   :  { %4404 = vmatprep.subr.bf16.mxu0 %v4403_v0 }
 0x252   :  { %4185 = vmatmul.mubr.f32.vlgmr.msra.gmra.mrb[4].mxu0 %v3164_v7 }
 0x253   :  { %4406 = vmatpush3.bf16.msra.mxu0 %v4403_v0  ;;  %4195 = vmatprep.mubr.f32.mxu0 %v5155_v24 }
 0x254   :  { %4408 = vmatprep.subr.bf16.mxu0 %v4407_v12 }
 0x257   :  { %4410 = vmatpush3.bf16.msra.mxu0 %v4407_v12 }
 0x258   :  { %4412 = vmatprep.subr.bf16.mxu0 %v4371_v54 }
 0x25a   :  { %4196 = vmatmul.mubr.f32.vlgmr.msra.gmra.mrb[4].mxu0 %v5206_v40 }
 0x25b   :  { %4414 = vmatpush3.bf16.msra.mxu0 %v4371_v54  ;;  %4206 = vmatprep.mubr.f32.mxu0 %v5155_v24  ;;  %v5228_v24 = vpop.xlane.xlu1 %2248 }
 0x25c   :  { %4416 = vmatprep.subr.bf16.mxu0 %v4375_v13 }
 0x25f   :  { %4418 = vmatpush3.bf16.msra.mxu0 %v4375_v13  ;;  %v5235_v46 = vpop.xlane.xlu1 %2284  ;;  %v5262_v13 = vpop.xlane.xlu0 %2471 }
 0x262   :  { %4207 = vmatmul.mubr.f32.vlgmr.msra.gmra.mrb[4].mxu0 %v5206_v40 }
 0x263   :  { %v2402_v47 = vpop.xlane.xlu1 %2401 }
 0x264   :  { %v5280_v23 = vsub.f32 %v5137_v52, %v2402_v47 }
 0x267   :  { %v2399_v48 = vpop.xlane.xlu1 %2398 }
 0x268   :  { %v5275_v20 = vsub.f32 %v5145_v2, %v2399_v48  ;;  %v2415_v2 = vmul.f32 1.442695, %v5280_v23 }
 0x26a   :  { %v2413_v25 = vmul.f32 1.442695, %v5275_v20 }
 0x26b   :  { %v5240_v51 = vpop.xlane.xlu1 %2407 }
 0x26f   :  { %v2405_v54 = vpop.xlane.xlu1 %2404 }
 0x270   :  { %v5243_v38 = vsub.f32 %v5159_v28, %v2405_v54 }
 0x272   :  { %v2417_v7 = vmul.f32 1.442695, %v5243_v38 }
 0x273   :  { %v2475_v31 = vpop.xlane.xlu1 %2474 }
 0x274   :  { %v5247_v37 = vsub.f32 %v5121_v39, %v2475_v31  ;;  %4535 = vpow2.f32 %v2417_v7 }
 0x276   :  { %v2480_v56 = vmul.f32 1.442695, %v5247_v37 }
 0x278   :  { %4537 = vpow2.f32 %v2480_v56 }
 0x27e   :  { %v4536_v50 = vpop.eup %4535 }
 0x27f   :  { %v2427_v58 = vsel %vm2214_vm2, %v4536_v50, 0.0 }
 0x282   :  { %v5251_v61 = vpop.eup %4537 }
 0x283   :  { %v2485_v28 = vsel %vm2214_vm2, %v5251_v61, 0.0 }
 0x2a7   :  { %v5221_v29 = vpop.f32.mrb[8].mxu1 }
 0x2a8   :  { %v4100_v30 = vpop.f32.mrb[9].mxu1 }
 0x2f8   :  { %v4142_v26 = vpop.f32.mrb[10].mxu1 }
 0x2f9   :  { %v5223_v27 = vpop.f32.mrb[11].mxu1  ;;  %v3019_v32 = vsel %vm2214_vm2, %v4142_v26, -inf }
 0x2fa   :  { %3020 = vmax.xlane.f32.xlu1 %v3019_v32  ;;  %v3016_v34 = vsel %vm2214_vm2, %v5223_v27, -inf }
 0x2fb   :  { %3017 = vmax.xlane.f32.xlu0 %v3016_v34 }
 0x335   :  { %v4208_v42 = vpop.f32.mrb[4].mxu0 }
 0x336   :  { %v5230_v43 = vpop.f32.mrb[5].mxu0  ;;  %v3614_v40 = vsel %vm2214_vm2, %v4208_v42, -inf }
 0x337   :  { %3615 = vmax.xlane.f32.xlu1 %v3614_v40  ;;  %v3611_v45 = vsel %vm2214_vm2, %v5230_v43, -inf }
 0x338   :  { %3612 = vmax.xlane.f32.xlu0 %v3611_v45  ;;  %v5310_v45 = vsub.f32 %v5069_v3, %v2282_v6  ;;  %v5323_v3 = vsub.f32 %v5071_v4, %v2336_v9 }
 0x33a   :  { %v2288_v54 = vmul.f32 1.442695, %v5310_v45 }
 0x34e   :  { %1745 = vperm.xlu0 %4510, %v1743_v49  }
 0x36d   :  { %2428 = vadd.xlane.f32.xlu0 %v2427_v58 }
 0x371   :  { %2486 = vadd.xlane.f32.xlu0 %v2485_v28  ;;  %v5341_v28 = vsub.f32 %v5125_v44, %v5262_v13 }
 0x387   :  { %v3021_v8 = vpop.xlane.xlu1 %3020 }
 0x388   :  { %v5255_v62 = vsub.f32 %v4142_v26, %v3021_v8  ;;  %v5268_v16 = vpop.xlane.xlu0 %3017  ;;  %v5287_v26 = vsub.f32 %v5058_v59, %v2333_v1 }
 0x38a   :  { %v3026_v39 = vmul.f32 1.442695, %v5255_v62 }
 0x38c   :  { %4539 = vpow2.f32 %v3026_v39 }
 0x38d   :  { %4541 = vpow2.f32 %v2341_v22 }
 0x396   :  { %v4540_v60 = vpop.eup %4539 }
 0x397   :  { %v3031_v0 = vsel %vm2214_vm2, %v4540_v60, 0.0  ;;  %v5290_v32 = vpop.eup %4541 }
 0x398   :  { %3032 = vadd.xlane.f32.xlu0 %v3031_v0  ;;  %v2349_v59 = vsel %vm2214_vm2, %v5290_v32, 0.0 }
 0x3c4   :  { %v3616_v11 = vpop.xlane.xlu1 %3615 }
 0x3c5   :  { %v5270_v18 = vsub.f32 %v4208_v42, %v3616_v11  ;;  %v5277_v12 = vpop.xlane.xlu0 %3612  ;;  %v5305_v42 = vsub.f32 %v5116_v33, %v5228_v24  ;;  %v5317_v33 = vsub.f32 %v5123_v41, %v5235_v46  ;;  %v2347_v41 = vmul.f32 1.442695, %v5323_v3 }
 0x3c6   :  { %v5333_v46 = vsub.f32 %v5152_v17, %v5240_v51  ;;  %v2478_v17 = vmul.f32 1.442695, %v5341_v28  ;;  %v5349_v51 = vsub.f32 %v5223_v27, %v5268_v16 }
 0x3c7   :  { %v3621_v19 = vmul.f32 1.442695, %v5270_v18  ;;  %v2254_v47 = vmul.f32 1.442695, %v5305_v42  ;;  %v2290_v7 = vmul.f32 1.442695, %v5317_v33 }
 0x3c8   :  { %v2419_v8 = vmul.f32 1.442695, %v5333_v46  ;;  %v3024_v44 = vmul.f32 1.442695, %v5349_v51 }
 0x3c9   :  { %4543 = vpow2.f32 %v3621_v19 }
 0x3ca   :  { %4545 = vpow2.f32 %v2343_v21 }
 0x3cb   :  { %4547 = vpow2.f32 %v2413_v25 }
 0x3cc   :  { %4549 = vpow2.f32 %v2415_v2 }
 0x3cd   :  { %v1746_v55 = vpop.permute.xlu0 %1745 }
 0x3ce   :  { %vm1747_vm4 = vcmp.eq.s32.totalorder %v5090_v15, %v1746_v55  ;;  %v2345_v15 = vmul.f32 1.442695, %v5287_v26 }
 0x3cf   :  { %v3677_v57 = vsel %vm1747_vm4, 1.0, %v4754_v53  ;;  %v5296_v53 = vsub.f32 %v5065_v63, %v2246_v5  ;;  %v5355_v5 = vsub.f32 %v5230_v43, %v5277_v12 }
 0x3d0   :  { %v2213_v30 = vmul.f32 %v3677_v57, %v5221_v29  ;;  %4551 = vpow2.f32 %v2345_v15 }
 0x3d1   :  { %v2252_v36 = vmul.f32 1.442695, %v5296_v53  ;;  %v3619_v27 = vmul.f32 1.442695, %v5355_v5 }
 0x3d2   :  { %v2215_v52 = vsel %vm2214_vm2, %v2213_v30, 0.0 }
 0x3d3   :  { %v4544_v34 = vpop.eup %4543  ;;  %2216 = vadd.xlane.f32.xlu1 %v2215_v52  ;;  %4553 = vpow2.f32 %v2252_v36 }
 0x3d4   :  { %v3626_v35 = vsel %vm2214_vm2, %v4544_v34, 0.0  ;;  %v5300_v29 = vpop.eup %4545  ;;  %4555 = vpow2.f32 %v2254_v47 }
 0x3d5   :  { %3627 = vadd.xlane.f32.xlu0 %v3626_v35  ;;  %v2352_v40 = vsel %vm2214_vm2, %v5300_v29, 0.0  ;;  %v4548_v63 = vpop.eup %4547  ;;  %4557 = vpow2.f32 %v2288_v54 }
 0x3d6   :  { %v2421_v48 = vsel %vm2214_vm2, %v4548_v63, 0.0  ;;  %v4550_v49 = vpop.eup %4549  ;;  %4559 = vpow2.f32 %v2290_v7 }
 0x3d7   :  { %2350 = vadd.xlane.f32.xlu1 %v2349_v59  ;;  %v2424_v24 = vsel %vm2214_vm2, %v4550_v49, 0.0  ;;  %4561 = vpow2.f32 %v2347_v41 }
 0x3d8   :  { %4563 = vpow2.f32 %v2419_v8 }
 0x3d9   :  { %4565 = vpow2.f32 %v2478_v17 }
 0x3da   :  { %v5320_v31 = vpop.eup %4551  ;;  %4567 = vpow2.f32 %v3024_v44 }
 0x3db   :  { %2353 = vadd.xlane.f32.xlu1 %v2352_v40  ;;  %v2355_v56 = vsel %vm2214_vm2, %v5320_v31, 0.0  ;;  %4569 = vpow2.f32 %v3619_v27 }
 0x3dd   :  { %v5328_v50 = vpop.eup %4553 }
 0x3de   :  { %v2256_v58 = vsel %vm1750_vm1, %v5328_v50, 0.0  ;;  %v5337_v4 = vpop.eup %4555 }
 0x3df   :  { %2422 = vadd.xlane.f32.xlu1 %v2421_v48  ;;  %v2259_v39 = vsel %vm1750_vm1, %v5337_v4, 0.0  ;;  %v4558_v60 = vpop.eup %4557 }
 0x3e0   :  { %v2292_v0 = vsel %vm1750_vm1, %v4558_v60, 0.0  ;;  %v4560_v1 = vpop.eup %4559 }
 0x3e1   :  { %v2295_v6 = vsel %vm1750_vm1, %v4560_v1, 0.0  ;;  %v5358_v9 = vpop.eup %4561 }
 0x3e2   :  { %v2358_v13 = vsel %vm2214_vm2, %v5358_v9, 0.0  ;;  %v4564_v22 = vpop.eup %4563 }
 0x3e3   :  { %2425 = vadd.xlane.f32.xlu1 %v2424_v24  ;;  %v2430_v11 = vsel %vm2214_vm2, %v4564_v22, 0.0  ;;  %v5364_v16 = vpop.eup %4565 }
 0x3e4   :  { %v2482_v43 = vsel %vm2214_vm2, %v5364_v16, 0.0  ;;  %v4568_v19 = vpop.eup %4567 }
 0x3e5   :  { %v3028_v21 = vsel %vm2214_vm2, %v4568_v19, 0.0  ;;  %v4570_v12 = vpop.eup %4569 }
 0x3e6   :  { %v3623_v25 = vsel %vm2214_vm2, %v4570_v12, 0.0 }
 0x3e7   :  { %2356 = vadd.xlane.f32.xlu1 %v2355_v56 }
 0x3eb   :  { %2257 = vadd.xlane.f32.xlu1 %v2256_v58 }
 0x3ef   :  { %2260 = vadd.xlane.f32.xlu1 %v2259_v39 }
 0x3f3   :  { %2293 = vadd.xlane.f32.xlu1 %v2292_v0 }
 0x3f7   :  { %2296 = vadd.xlane.f32.xlu1 %v2295_v6 }
 0x3fa   :  { %v2429_v63 = vpop.xlane.xlu0 %2428 }
 0x3fb   :  { %2359 = vadd.xlane.f32.xlu1 %v2358_v13 }
 0x3fe   :  { %v5370_v48 = vpop.xlane.xlu0 %2486 }
 0x3ff   :  { %2431 = vadd.xlane.f32.xlu1 %v2430_v11 }
 0x403   :  { %2483 = vadd.xlane.f32.xlu1 %v2482_v43 }
 0x407   :  { %3029 = vadd.xlane.f32.xlu1 %v3028_v21 }
 0x40b   :  { %3624 = vadd.xlane.f32.xlu1 %v3623_v25 }
 0x425   :  { %v3033_v56 = vpop.xlane.xlu0 %3032 }
 0x460   :  { %v2217_v55 = vpop.xlane.xlu1 %2216 }
 0x461   :  { %v2219_v57 = vand.u32 2147483647, %v2217_v55  ;;  %v2218_v24 = vmin.f32 %v2217_v55, 0.0 }
 0x462   :  { %v3628_v21 = vpop.xlane.xlu0 %3627 }
 0x463   :  { %v2220_v30 = vsub.f32 0.0, %v2219_v57 }
 0x464   :  { %v2351_v2 = vpop.xlane.xlu1 %2350 }
 0x465   :  { %v2221_v52 = vmul.f32 1.442695, %v2220_v30 }
 0x467   :  { %4571 = vpow2.f32 %v2221_v52 }
 0x468   :  { %v2354_v34 = vpop.xlane.xlu1 %2353 }
 0x46c   :  { %v2423_v35 = vpop.xlane.xlu1 %2422 }
 0x470   :  { %v2426_v15 = vpop.xlane.xlu1 %2425 }
 0x471   :  { %v4572_v59 = vpop.eup %4571 }
 0x472   :  { %v2223_v36 = vadd.f32 1.0, %v4572_v59 }
 0x474   :  { %4573 = vlog2.f32 %v2223_v36  ;;  %v2357_v40 = vpop.xlane.xlu1 %2356 }
 0x475   :  { %4575 = vlog2.f32 %v2429_v63 }
 0x476   :  { %4577 = vlog2.f32 %v2351_v2 }
 0x477   :  { %4579 = vlog2.f32 %v2354_v34 }
 0x478   :  { %v2258_v47 = vpop.xlane.xlu1 %2257  ;;  %4581 = vlog2.f32 %v2426_v15 }
 0x479   :  { %4583 = vlog2.f32 %v2258_v47 }
 0x47a   :  { %4585 = vlog2.f32 %v2423_v35 }
 0x47b   :  { %4587 = vlog2.f32 %v2357_v40 }
 0x47c   :  { %v2261_v49 = vpop.xlane.xlu1 %2260 }
 0x47d   :  { %4589 = vlog2.f32 %v2261_v49 }
 0x47e   :  { %v4574_v54 = vpop.eup %4573 }
 0x47f   :  { %v2225_v7 = vmul.f32 0.6931472, %v4574_v54  ;;  %v4576_v8 = vpop.eup %4575 }
 0x480   :  { %v2294_v41 = vpop.xlane.xlu1 %2293  ;;  %v4578_v60 = vpop.eup %4577 }
 0x481   :  { %4591 = vlog2.f32 %v2294_v41  ;;  %v2226_v58 = vsub.f32 %v2218_v24, %v2225_v7  ;;  %v4580_v0 = vpop.eup %4579  ;;  %v2370_v35 = vmul.f32 0.6931472, %v4578_v60 }
 0x482   :  { %4593 = vlog2.f32 %v3033_v56  ;;  %v4582_v1 = vpop.eup %4581  ;;  %v2372_v12 = vmul.f32 0.6931472, %v4580_v0 }
 0x483   :  { %v2228_v39 = vsel %vm2227_vm5, %v2226_v58, 0.0  ;;  %4595 = vrcp.f32 %v2258_v47  ;;  %v4584_v44 = vpop.eup %4583  ;;  %v2436_v22 = vmul.f32 0.6931472, %v4582_v1 }
 0x484   :  { %2229 = vadd.xlane.f32.xlu1 %v2228_v39  ;;  %v2297_v17 = vpop.xlane.xlu1 %2296  ;;  %v4586_v6 = vpop.eup %4585  ;;  %v2267_v43 = vmul.f32 0.6931472, %v4584_v44  ;;  %v2378_v47 = vsub.f32 %v5266_v14, %v2372_v12 }
 0x485   :  { %4597 = vlog2.f32 %v2297_v17  ;;  %v4588_v13 = vpop.eup %4587  ;;  %v2434_v25 = vmul.f32 0.6931472, %v4586_v6 }
 0x486   :  { %4599 = vrcp.f32 %v2354_v34  ;;  %v2374_v55 = vmul.f32 0.6931472, %v4588_v13  ;;  %v2438_v34 = vmul.f32 0.6931472, %v4576_v8  ;;  %v2270_v59 = vsub.f32 %v5296_v53, %v2267_v43 }
 0x487   :  { %4601 = vrcp.f32 %v2261_v49  ;;  %v4590_v11 = vpop.eup %4589  ;;  %v2441_v49 = vsub.f32 %v5275_v20, %v2434_v25  ;;  %v2377_v53 = vsub.f32 %v5260_v10, %v2370_v35 }
 0x488   :  { %4603 = vrcp.f32 %v2351_v2  ;;  %v2360_v27 = vpop.xlane.xlu1 %2359  ;;  %v2442_v2 = vsub.f32 %v5280_v23, %v2436_v22  ;;  %v2269_v36 = vmul.f32 0.6931472, %v4590_v11  ;;  %v2379_v24 = vsub.f32 %v5287_v26, %v2374_v55 }
 0x489   :  { %4605 = vrcp.f32 %v2357_v40  ;;  %v2443_v58 = vsub.f32 %v5243_v38, %v2438_v34  ;;  %v2445_v26 = vsub.f32 %v2377_v53, %v2441_v49 }
 0x48a   :  { %4607 = vlog2.f32 %v2360_v27  ;;  %v2446_v8 = vsub.f32 %v2378_v47, %v2442_v2 }
 0x48b   :  { %v4592_v19 = vpop.eup %4591  ;;  %4609 = vlog2.f32 %v5370_v48  ;;  %v2447_v6 = vsub.f32 %v2379_v24, %v2443_v58 }
 0x48c   :  { %v2299_v57 = vmul.f32 0.6931472, %v4592_v19  ;;  %v2432_v30 = vpop.xlane.xlu1 %2431  ;;  %v4594_v52 = vpop.eup %4593 }
 0x48d   :  { %4611 = vlog2.f32 %v2432_v30  ;;  %v4596_v15 = vpop.eup %4595  ;;  %v3037_v11 = vmul.f32 0.6931472, %v4594_v52 }
 0x48e   :  { %4613 = vlog2.f32 %v3628_v21  ;;  %v2302_v40 = vsub.f32 %v5310_v45, %v2299_v57  ;;  %v2271_v45 = vsub.f32 %v5305_v42, %v2269_v36  ;;  %v2263_v20 = vmul.f32 %v4596_v15, %v5328_v50 }
 0x48f   :  { %v4598_v63 = vpop.eup %4597  ;;  %4615 = vrcp.f32 %v2360_v27  ;;  %v3039_v34 = vsub.f32 %v5255_v62, %v3037_v11 }
 0x490   :  { %v4600_v54 = vpop.eup %4599  ;;  %v2301_v7 = vmul.f32 0.6931472, %v4598_v63  ;;  %v2484_v56 = vpop.xlane.xlu1 %2483  ;;  %v2304_v23 = vsub.f32 %v2270_v59, %v2302_v40 }
 0x491   :  { %v4602_v41 = vpop.eup %4601  ;;  %4617 = vlog2.f32 %v2484_v56  ;;  %v2364_v17 = vmul.f32 %v4600_v54, %v5300_v29 }
 0x492   :  { %v4604_v39 = vpop.eup %4603  ;;  %v2303_v14 = vsub.f32 %v5317_v33, %v2301_v7  ;;  %4619 = vrcp.f32 %v5370_v48  ;;  %v2265_v38 = vmul.f32 %v4602_v41, %v5337_v4  ;;  %v2306_v44 = vmul.f32 %v2304_v23, %v2263_v20 }
 0x493   :  { %v4606_v60 = vpop.eup %4605  ;;  %v2362_v42 = vmul.f32 %v4604_v39, %v5290_v32  ;;  %v2450_v22 = vmul.f32 %v2446_v8, %v2364_v17 }
 0x494   :  { %v4608_v0 = vpop.eup %4607  ;;  %v3030_v1 = vpop.xlane.xlu1 %3029  ;;  %v2305_v10 = vsub.f32 %v2271_v45, %v2303_v14  ;;  %v2366_v50 = vmul.f32 %v4606_v60, %v5320_v31  ;;  %v2308_v4 = vsel %vm1750_vm1, %v2306_v44, 0.0 }
 0x495   :  { %4621 = vlog2.f32 %v3030_v1  ;;  %v4610_v33 = vpop.eup %4609  ;;  %v2376_v27 = vmul.f32 0.6931472, %v4608_v0  ;;  %v2449_v29 = vmul.f32 %v2445_v26, %v2362_v42  ;;  %v2454_v52 = vsel %vm2214_vm2, %v2450_v22, 0.0 }
 0x496   :  { %v2307_v13 = vmul.f32 %v2305_v10, %v2265_v38  ;;  %4623 = vrcp.f32 %v2484_v56  ;;  %v2451_v25 = vmul.f32 %v2447_v6, %v2366_v50  ;;  %v2495_v32 = vmul.f32 0.6931472, %v4610_v33 }
 0x497   :  { %v4612_v48 = vpop.eup %4611  ;;  %v2380_v30 = vsub.f32 %v5323_v3, %v2376_v27  ;;  %v2453_v36 = vsel %vm2214_vm2, %v2449_v29, 0.0 }
 0x498   :  { %v4614_v43 = vpop.eup %4613  ;;  %v2440_v19 = vmul.f32 0.6931472, %v4612_v48  ;;  %v3625_v21 = vpop.xlane.xlu1 %3624  ;;  %v2309_v12 = vsel %vm1750_vm1, %v2307_v13, 0.0  ;;  %v2456_v40 = vsel %vm2214_vm2, %v2451_v25, 0.0  ;;  %v2497_v47 = vsub.f32 %v5247_v37, %v2495_v32 }
 0x499   :  { %v4616_v55 = vpop.eup %4615  ;;  %4625 = vlog2.f32 %v3625_v21  ;;  %v2310_v57 = vadd.f32 %v2309_v12, %v2308_v4  ;;  %v3632_v35 = vmul.f32 0.6931472, %v4614_v43  ;;  %v2455_v3 = vadd.f32 %v2454_v52, %v2453_v36 }
 0x49a   :  { %v2444_v31 = vsub.f32 %v5333_v46, %v2440_v19  ;;  %v2368_v15 = vmul.f32 %v4616_v55, %v5358_v9  ;;  %v3041_v7 = vsub.f32 %v2497_v47, %v3039_v34 }
 0x49b   :  { %2311 = vadd.xlane.f32.xlu0 %v2310_v57  ;;  %v4618_v2 = vpop.eup %4617  ;;  %v2457_v24 = vadd.f32 %v2456_v40, %v2455_v3  ;;  %v3634_v62 = vsub.f32 %v5270_v18, %v3632_v35 }
 0x49c   :  { %v2448_v59 = vsub.f32 %v2380_v30, %v2444_v31  ;;  %v4620_v63 = vpop.eup %4619  ;;  %v2493_v49 = vmul.f32 0.6931472, %v4618_v2 }
 0x49d   :  { %v2491_v58 = vmul.f32 %v4620_v63, %v5251_v61  ;;  %v3636_v60 = vsub.f32 %v2497_v47, %v3634_v62 }
 0x49e   :  { %v2452_v46 = vmul.f32 %v2448_v59, %v2368_v15  ;;  %v2496_v53 = vsub.f32 %v5341_v28, %v2493_v49 }
 0x49f   :  { %v4622_v54 = vpop.eup %4621  ;;  %v3043_v39 = vmul.f32 %v3041_v7, %v2491_v58  ;;  %v3638_v1 = vmul.f32 %v3636_v60, %v2491_v58 }
 0x4a0   :  { %v3035_v56 = vmul.f32 0.6931472, %v4622_v54  ;;  %v2458_v23 = vsel %vm2214_vm2, %v2452_v46, 0.0  ;;  %v4624_v9 = vpop.eup %4623 }
 0x4a1   :  { %v2459_v41 = vadd.f32 %v2458_v23, %v2457_v24  ;;  %v2489_v14 = vmul.f32 %v4624_v9, %v5364_v16  ;;  %v3045_v0 = vsel %vm2214_vm2, %v3043_v39, 0.0  ;;  %v3640_v10 = vsel %vm2214_vm2, %v3638_v1, 0.0 }
 0x4a2   :  { %v3038_v8 = vsub.f32 %v5349_v51, %v3035_v56 }
 0x4a3   :  { %v4626_v37 = vpop.eup %4625  ;;  %2460 = vadd.xlane.f32.xlu1 %v2459_v41 }
 0x4a4   :  { %v3630_v45 = vmul.f32 0.6931472, %v4626_v37  ;;  %v3040_v20 = vsub.f32 %v2496_v53, %v3038_v8 }
 0x4a6   :  { %v3633_v18 = vsub.f32 %v5355_v5, %v3630_v45  ;;  %v3042_v26 = vmul.f32 %v3040_v20, %v2489_v14 }
 0x4a8   :  { %v3044_v17 = vsel %vm2214_vm2, %v3042_v26, 0.0  ;;  %v3635_v61 = vsub.f32 %v2496_v53, %v3633_v18 }
 0x4a9   :  { %v3046_v28 = vadd.f32 %v3045_v0, %v3044_v17 }
 0x4aa   :  { %v3637_v38 = vmul.f32 %v3635_v61, %v2489_v14 }
 0x4ab   :  { %3047 = vadd.xlane.f32.xlu0 %v3046_v28 }
 0x4ac   :  { %v3639_v51 = vsel %vm2214_vm2, %v3637_v38, 0.0 }
 0x4ad   :  { %v3641_v44 = vadd.f32 %v3640_v10, %v3639_v51 }
 0x4af   :  { %3642 = vadd.xlane.f32.xlu1 %v3641_v44 }
 0x511   :  { %v2230_v16 = vpop.xlane.xlu1 %2229 }
 0x512   :  { %v2231_v6 = vrot.slane %v2230_v16, 4 }
 0x514   :  { %v2232_v42 = vadd.f32 %v2231_v6, %v2230_v16 }
 0x516   :  { %v2233_v5 = vrot.slane %v2232_v42, 2 }
 0x518   :  { %v2234_v33 = vadd.f32 %v2233_v5, %v2232_v42 }
 0x51a   :  { %v2235_v27 = vrot.slane %v2234_v33, 1 }
 0x51c   :  { %v2236_v13 = vadd.f32 %v2235_v27, %v2234_v33 }
 0x51e   :  { %4489 = vpush %v2236_v13 }
 0x528   :  { %v2312_v50 = vpop.xlane.xlu0 %2311 }
 0x529   :  { %v2313_v22 = vrot.slane %v2312_v50, 4 }
 0x52b   :  { %v2314_v48 = vadd.f32 %v2313_v22, %v2312_v50 }
 0x52d   :  { %v2315_v11 = vrot.slane %v2314_v48, 2 }
 0x52f   :  { %v2316_v29 = vadd.f32 %v2315_v11, %v2314_v48 }
 0x530   :  { %v2461_v43 = vpop.xlane.xlu1 %2460 }
 0x531   :  { %v2462_v19 = vrot.slane %v2461_v43, 4  ;;  %v2317_v21 = vrot.slane %v2316_v29, 1 }
 0x533   :  { %v2463_v4 = vadd.f32 %v2462_v19, %v2461_v43  ;;  %v2318_v12 = vadd.f32 %v2317_v21, %v2316_v29 }
 0x535   :  { %v2464_v25 = vrot.slane %v2463_v4, 2  ;;  %4491 = vpush %v2318_v12 }
 0x537   :  { %v2465_v55 = vadd.f32 %v2464_v25, %v2463_v4 }
 0x538   :  { %v3048_v32 = vpop.xlane.xlu0 %3047 }
 0x539   :  { %v3049_v57 = vrot.slane %v3048_v32, 4  ;;  %v2466_v30 = vrot.slane %v2465_v55, 1 }
 0x53b   :  { %v3050_v31 = vadd.f32 %v3049_v57, %v3048_v32  ;;  %v2467_v52 = vadd.f32 %v2466_v30, %v2465_v55 }
 0x53c   :  { %v3643_v34 = vpop.xlane.xlu1 %3642 }
 0x53d   :  { %v3051_v35 = vrot.slane %v3050_v31, 2  ;;  %v3644_v2 = vrot.slane %v3643_v34, 4  ;;  %4493 = vpush %v2467_v52 }
 0x53f   :  { %v3052_v15 = vadd.f32 %v3051_v35, %v3050_v31  ;;  %v3645_v59 = vadd.f32 %v3644_v2, %v3643_v34 }
 0x541   :  { %v3646_v36 = vrot.slane %v3645_v59, 2  ;;  %v3053_v40 = vrot.slane %v3052_v15, 1 }
 0x543   :  { %v3647_v63 = vadd.f32 %v3646_v36, %v3645_v59  ;;  %v3054_v47 = vadd.f32 %v3053_v40, %v3052_v15 }
 0x545   :  { %4495 = vpush %v3054_v47  ;;  %v3648_v3 = vrot.slane %v3647_v63, 1 }
 0x547   :  { %v3649_v49 = vadd.f32 %v3648_v3, %v3647_v63 }
 0x549   :  { %4497 = vpush %v3649_v49 }
 0x54f   :  { %s4490_s6 = spop %4489 }
 0x550   :  { %v2238_v46 = vstv %s4490_s6 }
 0x551   :  { %v2239_v24 = vsub.f32 0.0, %v2238_v46 }
 0x553   :  { %v2241_v9 = vmul.f32 0.125, %v2239_v24 }
 0x566   :  { %s4492_s11 = spop %4491 }
 0x567   :  { %v2320_v7 = vstv %s4492_s11 }
 0x56e   :  { %s4494_s12 = spop %4493 }
 0x56f   :  { %v2469_v54 = vstv %s4494_s12 }
 0x570   :  { %v3652_v62 = vadd.f32 %v2469_v54, %v2320_v7 }
 0x572   :  { %v3653_v58 = vadd.f32 %v3652_v62, %v2241_v9 }
 0x576   :  { %s4496_s15 = spop %4495 }
 0x577   :  { %v3056_v56 = vstv %s4496_s15 }
 0x57a   :  { %s4498_s16 = spop %4497 }
 0x57b   :  { %v3651_v23 = vstv %s4498_s16 }
 0x57c   :  { %v3654_v41 = vadd.f32 %v3651_v23, %v3056_v56 }
 0x57e   :  { %v3655_v53 = vmul.f32 0.001, %v3654_v41 }
 0x580   :  { %v3656_v8 = vadd.f32 %v3655_v53, %v3653_v58 }
 0x582   :  { %3658 = vst.msk [vmem:[#allocation10] sm:$0x1] %vm3657_vm6, %v3656_v8 }
 0x583   :  { %4726 = shalt.err (!%p4723_p8)
}
 0x584   :  { %s4727_s21 = scalar_lea.hbm %s5429_s7, 16 }
 0x585   :  { %p4728_p9 = scmp.ne.s32.totalorder %s5429_s7, %s4727_s21  ;;  %p4731_p10 = scmp.lt.u32.totalorder %s4727_s21, %s5429_s7 }
 0x587   :  { %p4733_p11 = pnand %p4731_p10, %p4728_p9 }
 0x589   :  { %4736 = shalt.err (!%p4733_p11)
}
 0x58a   :  { %3668 = dma.vmem_to_hbm [thread:$0]  %s3666_s27, 16, %s5429_s7, [#allocation4]  }
 0x58b   :  { %4743 = dma.done.wait [#allocation4], 16  }
 0x58c   :  { %4744 = vsyncadd [#allocation4], 4294967280 }
 0x58d   :  { %3672 = vsyncpa [#allocation3], 1 }
 0x58e   :  { %3673 = vsyncpa [#allocation6], 1 }
 0x58f   :  { %3674 = vsyncpa [#allocation9], 1 }
 0x590   :  { %3675 = vsyncpa [#allocation4], 1 }

</bundles_post_ra>
